<compile_context>
chip_gen: v6e
topology: v6e:2x2x1
jax: 0.10.0
libtpu: 0.0.40
codegen_flags: <defaults>
</compile_context>

<pallas_src>
import numpy as np

import jax
import jax.numpy as jnp
from jax import lax
from jax.experimental import pallas as pl
from jax.experimental.pallas import tpu as pltpu


# ------------------------------------------------------------------ kernel ---

def _fused_cnn_kernel(p1_ref, w1_ref, b1_ref, w2_ref, b2_ref, fcw_ref, fcb_ref,
                      o_ref):
    BB = o_ref.shape[2]          # samples per grid step
    S1 = 324 * BB                # pool1 tap slab width (lanes)
    T = 36 * BB                  # conv2-tap slab width within a pool1 slab
    S2 = 9 * BB                  # pool2 tap slab width

    # conv1 raw accumulator: (16, 32) bf16 @ (32, 1296*BB) bf16 -> f32.
    a1 = jnp.dot(w1_ref[...], p1_ref[0], preferred_element_type=jnp.float32)

    # maxpool1 (BEFORE bias+ReLU) fused with the per-conv2-tap regrouping:
    # tap t of the pooled/biased/ReLU'd activations is stacked onto sublanes
    # [t*16, (t+1)*16) so conv2 becomes a single K=144 matmul.
    b1 = b1_ref[...]
    slabs = []
    for t in range(9):                                    # static unroll
        c0 = t * T
        m = jnp.maximum(
            jnp.maximum(a1[:, c0:c0 + T], a1[:, S1 + c0:S1 + c0 + T]),
            jnp.maximum(a1[:, 2 * S1 + c0:2 * S1 + c0 + T],
                        a1[:, 3 * S1 + c0:3 * S1 + c0 + T]))
        slabs.append(jnp.maximum(m + b1, 0.0).astype(jnp.bfloat16))
    rhs2 = jnp.concatenate(slabs, axis=0)                 # (144, 36*BB) bf16

    # conv2 (one folded matmul) -> maxpool2 -> bias -> ReLU.
    a2 = jnp.dot(w2_ref[...], rhs2, preferred_element_type=jnp.float32)
    p2 = jnp.maximum(jnp.maximum(a2[:, 0:S2], a2[:, S2:2 * S2]),
                     jnp.maximum(a2[:, 2 * S2:3 * S2], a2[:, 3 * S2:4 * S2]))
    p2 = jnp.maximum(p2 + b2_ref[...], 0.0)               # (16, 9*BB) f32

    # fc + sigmoid in f32 on the VPU: stack the 9 spatial positions onto the
    # sublane axis -> (144, BB) and reduce against the (144, 2) fc weights.
    fc_rhs = jnp.concatenate([p2[:, j * BB:(j + 1) * BB] for j in range(9)],
                             axis=0)                      # (144, BB)
    z0 = jnp.sum(fcw_ref[:, 0:1] * fc_rhs, axis=0, keepdims=True)
    z1 = jnp.sum(fcw_ref[:, 1:2] * fc_rhs, axis=0, keepdims=True)
    z = jnp.concatenate([z0, z1], axis=0) + fcb_ref[...]  # (2, BB)
    o_ref[0] = 0.5 * (jnp.tanh(0.5 * z) + 1.0)            # stable sigmoid


# ------------------------------------------------------- host-side prep ---
# Per-sample column digits (outer -> inner): (a, b, kh, kw, r2, s2, q, p) with
#   conv1 output position oh = 8q + 4r2 + 2kh + a, ow = 8p + 4s2 + 2kw + b
#   (a, b)  : maxpool1 2x2 tap          (kh, kw): conv2 kernel tap
#   (r2, s2): maxpool2 2x2 tap          (q, p)  : final 3x3 spatial position
# The sample index inside a batch block is the innermost lane digit.

def _build_patch_flat_indices():
    a, b, kh, kw, r2, s2, q, p = np.meshgrid(
        np.arange(2), np.arange(2), np.arange(3), np.arange(3),
        np.arange(2), np.arange(2), np.arange(3), np.arange(3), indexing="ij")
    oh = (8 * q + 4 * r2 + 2 * kh + a).reshape(-1)        # (1296,)
    ow = (8 * p + 4 * s2 + 2 * kw + b).reshape(-1)
    i1 = np.repeat(np.arange(3), 3)                       # conv1 kernel row
    j1 = np.tile(np.arange(3), 3)                         # conv1 kernel col
    flat = (2 * oh[None, :] + i1[:, None]) * 64 + (2 * ow[None, :] + j1[:, None])
    return flat.reshape(-1).astype(np.int32)              # (9 * 1296,)


_PATCH_IDX = _build_patch_flat_indices()


def _build_conv1_patchesT(x, BB):
    """x: (Bp, 3, 64, 64) f32 -> (Bp//BB, 32, 1296*BB) bf16 transposed im2col."""
    Bp = x.shape[0]
    G = Bp // BB
    xf = x.astype(jnp.bfloat16).reshape(Bp, 3, 64 * 64)   # cast before big copies
    g = jnp.take(xf, jnp.asarray(_PATCH_IDX), axis=2)     # (Bp, 3, 9*1296) gather
    p = g.reshape(Bp, 27, 1296)                           # rows = c*9 + i1*3 + j1
    p = jnp.pad(p, ((0, 0), (0, 5), (0, 0)))              # K rows 27 -> 32 (zeros)
    p = p.reshape(G, BB, 32, 1296).transpose(0, 2, 3, 1)  # sample -> innermost lane
    return p.reshape(G, 32, 1296 * BB)


def _prep_params(params):
    w1, b1 = params["conv1_w"], params["conv1_b"]
    w2, b2 = params["conv2_w"], params["conv2_b"]
    fw, fb = params["fc_w"], params["fc_b"]

    w1p = (jnp.zeros((16, 32), jnp.float32)
           .at[:10, :27].set(w1.reshape(10, 27)).astype(jnp.bfloat16))
    b1p = jnp.zeros((16, 1), jnp.float32).at[:10, 0].set(b1)

    # conv2 weights folded to (16_out, 144) with column index = t*16 + c_in,
    # t = kh*3 + kw (matches the sublane stacking order of rhs2 in the kernel).
    w2t = w2.transpose(2, 3, 0, 1).reshape(9, 10, 10)      # [t, out, in]
    w2p = jnp.zeros((9, 16, 16), jnp.float32).at[:, :10, :10].set(w2t)
    w2f = w2p.transpose(1, 0, 2).reshape(16, 144).astype(jnp.bfloat16)
    b2p = jnp.zeros((16, 1), jnp.float32).at[:10, 0].set(b2)

    # fc weights transposed to (144, 2) with row index = j*16 + c,
    # j = q*3 + p (PyTorch flatten order is c*9 + j).
    fw3 = fw.reshape(2, 10, 9).transpose(2, 1, 0)          # [j, c, n]
    fcwT = (jnp.zeros((9, 16, 2), jnp.float32)
            .at[:, :10, :].set(fw3).reshape(144, 2))
    fbp = fb.reshape(2, 1)
    return w1p, b1p, w2f, b2p, fcwT, fbp


# ----------------------------------------------------------------- model ---

def _choose_block_batch(B):
    # BB=32 keeps per-step VMEM ~10 MiB (safe for v7x's 64 MiB even with a
    # 3-deep patch buffer) and large batches give both v7x TCs several steps.
    return B if B <= 32 else 32


def cnn_forward(params, x, *, block_batch=None):
    B, C, H, W = x.shape
    assert (C, H, W) == (3, 64, 64), "kernel is specialized to 3x64x64 inputs"
    BB = block_batch or _choose_block_batch(B)
    G = pl.cdiv(B, BB)
    Bp = G * BB
    if Bp != B:
        x = jnp.pad(x, ((0, Bp - B), (0, 0), (0, 0), (0, 0)))

    p1t = _build_conv1_patchesT(x, BB)                     # (G, 32, 1296*BB)
    w1p, b1p, w2f, b2p, fcwT, fbp = _prep_params(params)
    LB = 1296 * BB

    patch_kwargs = {}
    if G >= 3:      # deeper buffering only pays once there is a real pipeline
        patch_kwargs["pipeline_mode"] = pl.Buffered(3)

    out = pl.pallas_call(
        _fused_cnn_kernel,
        out_shape=jax.ShapeDtypeStruct((G, 2, BB), jnp.float32),
        grid=(G,),
        in_specs=[
            pl.BlockSpec((1, 32, LB), lambda g: (g, 0, 0), **patch_kwargs),
            pl.BlockSpec((16, 32), lambda g: (0, 0)),      # conv1 weights
            pl.BlockSpec((16, 1), lambda g: (0, 0)),       # conv1 bias
            pl.BlockSpec((16, 144), lambda g: (0, 0)),     # conv2 weights (folded)
            pl.BlockSpec((16, 1), lambda g: (0, 0)),       # conv2 bias
            pl.BlockSpec((144, 2), lambda g: (0, 0)),      # fc weights (transposed)
            pl.BlockSpec((2, 1), lambda g: (0, 0)),        # fc bias
        ],
        out_specs=pl.BlockSpec((1, 2, BB), lambda g: (g, 0, 0)),
        compiler_params=pltpu.CompilerParams(
            dimension_semantics=("parallel",)),
    )(p1t, w1p, b1p, w2f, b2p, fcwT, fbp)

    return out.transpose(0, 2, 1).reshape(Bp, 2)[:B]


def init_params(key):
    ks = jax.random.split(key, 6)

    def uinit(k, shape, fan_in):
        bound = 1.0 / jnp.sqrt(jnp.float32(fan_in))
        return jax.random.uniform(k, shape, jnp.float32, -bound, bound)

    return {
        "conv1_w": uinit(ks[0], (10, 3, 3, 3), 3 * 3 * 3),
        "conv1_b": uinit(ks[1], (10,), 3 * 3 * 3),
        "conv2_w": uinit(ks[2], (10, 10, 3, 3), 10 * 3 * 3),
        "conv2_b": uinit(ks[3], (10,), 10 * 3 * 3),
        "fc_w":    uinit(ks[4], (2, 90), 90),   # PyTorch Linear: (out, in)
        "fc_b":    uinit(ks[5], (2,), 90),
    }


def cnn_reference(params, x):
    # Pure-JAX reference.  Conv inputs are cast to bf16 (matching the kernel's
    # MXU numerics, f32 accumulate); bias/ReLU/pool/fc/sigmoid stay f32.
    def conv_relu(h, w, b, stride):
        y = lax.conv_general_dilated(
            h.astype(jnp.bfloat16), w.astype(jnp.bfloat16),
            (stride, stride), "VALID",
            dimension_numbers=("NCHW", "OIHW", "NCHW"),
            preferred_element_type=jnp.float32)
        return jnp.maximum(y + b[None, :, None, None], 0.0)

    def pool(h):
        return lax.reduce_window(h, -jnp.inf, lax.max,
                                 (1, 1, 2, 2), (1, 1, 2, 2), "VALID")

    h = pool(conv_relu(x, params["conv1_w"], params["conv1_b"], 2))
    h = pool(conv_relu(h, params["conv2_w"], params["conv2_b"], 2))
    h = h.reshape(h.shape[0], -1)
    z = jnp.dot(h, params["fc_w"].T,
                precision=lax.Precision.HIGHEST) + params["fc_b"]
    return jax.nn.sigmoid(z)


if __name__ == "__main__":
    key = jax.random.PRNGKey(0)
    pkey, xkey = jax.random.split(key)
    params = init_params(pkey)
    # 64x64 input is the size implied by fc(in_features=3*3*10).
    x = jax.random.normal(xkey, (2, 3, 64, 64), jnp.float32)

    out = jax.block_until_ready(jax.jit(cnn_forward)(params, x))
    ref = cnn_reference(params, x)

    assert out.shape == (2, 2), out.shape
    assert jnp.allclose(out, ref, atol=2e-2, rtol=2e-2), (out, ref)
    print("KERNEL_OK")
</pallas_src>

<mosaic_0001>
module attributes {stable_mosaic.version = 11 : i64} {
  func.func @_fused_cnn_kernel(%arg0: i32, %arg1: memref<1x32x2592xbf16, #tpu.memory_space<vmem>>, %arg2: memref<16x32xbf16, #tpu.memory_space<vmem>>, %arg3: memref<16x1xf32, #tpu.memory_space<vmem>>, %arg4: memref<16x144xbf16, #tpu.memory_space<vmem>>, %arg5: memref<16x1xf32, #tpu.memory_space<vmem>>, %arg6: memref<144x2xf32, #tpu.memory_space<vmem>>, %arg7: memref<2x1xf32, #tpu.memory_space<vmem>>, %arg8: memref<1x2x2xf32, #tpu.memory_space<vmem>>) attributes {dimension_semantics = [#tpu.dimension_semantics<parallel>], iteration_bounds = array<i64: 1>, scalar_prefetch = 0 : i64, scratch_operands = 0 : i64, tpu.core_type = #tpu.core_type<tc>, window_params = [{transform_indices = @transform_0, window_bounds = array<i64: 1, 32, 2592>}, {pipeline_mode = #tpu.pipeline_mode<synchronous>, transform_indices = @transform_1, window_bounds = array<i64: 16, 32>}, {pipeline_mode = #tpu.pipeline_mode<synchronous>, transform_indices = @transform_2, window_bounds = array<i64: 16, 1>}, {pipeline_mode = #tpu.pipeline_mode<synchronous>, transform_indices = @transform_3, window_bounds = array<i64: 16, 144>}, {pipeline_mode = #tpu.pipeline_mode<synchronous>, transform_indices = @transform_4, window_bounds = array<i64: 16, 1>}, {pipeline_mode = #tpu.pipeline_mode<synchronous>, transform_indices = @transform_5, window_bounds = array<i64: 144, 2>}, {pipeline_mode = #tpu.pipeline_mode<synchronous>, transform_indices = @transform_6, window_bounds = array<i64: 2, 1>}, {transform_indices = @transform_7, window_bounds = array<i64: 1, 2, 2>}]} {
    %c0 = arith.constant 0 : index
    %c0_0 = arith.constant 0 : index
    %0 = vector.load %arg2[%c0, %c0_0] : memref<16x32xbf16, #tpu.memory_space<vmem>>, vector<16x32xbf16>
    %c0_1 = arith.constant 0 : index
    %c0_2 = arith.constant 0 : index
    %c0_3 = arith.constant 0 : index
    %1 = vector.load %arg1[%c0_1, %c0_2, %c0_3] : memref<1x32x2592xbf16, #tpu.memory_space<vmem>>, vector<1x32x2592xbf16>
    %2 = vector.shape_cast %1 : vector<1x32x2592xbf16> to vector<32x2592xbf16>
    %cst = arith.constant dense<0.000000e+00> : vector<16x2592xf32>
    %3 = tpu.matmul %0, %2, %cst {dimension_numbers = #tpu.dot_dimension_numbers<[1], [0], [0], [1], [0, 0, 1, 1], [], []>} : vector<16x32xbf16>, vector<32x2592xbf16>, vector<16x2592xf32> -> vector<16x2592xf32>
    %c0_4 = arith.constant 0 : index
    %c0_5 = arith.constant 0 : index
    %4 = vector.load %arg3[%c0_4, %c0_5] : memref<16x1xf32, #tpu.memory_space<vmem>>, vector<16x1xf32>
    %5 = vector.extract_strided_slice %3 {offsets = [0, 0], sizes = [16, 72], strides = [1, 1]} : vector<16x2592xf32> to vector<16x72xf32>
    %6 = vector.extract_strided_slice %3 {offsets = [0, 648], sizes = [16, 72], strides = [1, 1]} : vector<16x2592xf32> to vector<16x72xf32>
    %7 = arith.maximumf %5, %6 : vector<16x72xf32>
    %8 = vector.extract_strided_slice %3 {offsets = [0, 1296], sizes = [16, 72], strides = [1, 1]} : vector<16x2592xf32> to vector<16x72xf32>
    %9 = vector.extract_strided_slice %3 {offsets = [0, 1944], sizes = [16, 72], strides = [1, 1]} : vector<16x2592xf32> to vector<16x72xf32>
    %10 = arith.maximumf %8, %9 : vector<16x72xf32>
    %11 = arith.maximumf %7, %10 : vector<16x72xf32>
    %12 = vector.broadcast %4 : vector<16x1xf32> to vector<16x72xf32>
    %13 = arith.addf %11, %12 : vector<16x72xf32>
    %cst_6 = arith.constant 0.000000e+00 : f32
    %14 = vector.broadcast %cst_6 : f32 to vector<16x72xf32>
    %15 = arith.maximumf %13, %14 : vector<16x72xf32>
    %16 = arith.truncf %15 : vector<16x72xf32> to vector<16x72xbf16>
    %17 = vector.extract_strided_slice %3 {offsets = [0, 72], sizes = [16, 72], strides = [1, 1]} : vector<16x2592xf32> to vector<16x72xf32>
    %18 = vector.extract_strided_slice %3 {offsets = [0, 720], sizes = [16, 72], strides = [1, 1]} : vector<16x2592xf32> to vector<16x72xf32>
    %19 = arith.maximumf %17, %18 : vector<16x72xf32>
    %20 = vector.extract_strided_slice %3 {offsets = [0, 1368], sizes = [16, 72], strides = [1, 1]} : vector<16x2592xf32> to vector<16x72xf32>
    %21 = vector.extract_strided_slice %3 {offsets = [0, 2016], sizes = [16, 72], strides = [1, 1]} : vector<16x2592xf32> to vector<16x72xf32>
    %22 = arith.maximumf %20, %21 : vector<16x72xf32>
    %23 = arith.maximumf %19, %22 : vector<16x72xf32>
    %24 = vector.broadcast %4 : vector<16x1xf32> to vector<16x72xf32>
    %25 = arith.addf %23, %24 : vector<16x72xf32>
    %cst_7 = arith.constant 0.000000e+00 : f32
    %26 = vector.broadcast %cst_7 : f32 to vector<16x72xf32>
    %27 = arith.maximumf %25, %26 : vector<16x72xf32>
    %28 = arith.truncf %27 : vector<16x72xf32> to vector<16x72xbf16>
    %29 = vector.extract_strided_slice %3 {offsets = [0, 144], sizes = [16, 72], strides = [1, 1]} : vector<16x2592xf32> to vector<16x72xf32>
    %30 = vector.extract_strided_slice %3 {offsets = [0, 792], sizes = [16, 72], strides = [1, 1]} : vector<16x2592xf32> to vector<16x72xf32>
    %31 = arith.maximumf %29, %30 : vector<16x72xf32>
    %32 = vector.extract_strided_slice %3 {offsets = [0, 1440], sizes = [16, 72], strides = [1, 1]} : vector<16x2592xf32> to vector<16x72xf32>
    %33 = vector.extract_strided_slice %3 {offsets = [0, 2088], sizes = [16, 72], strides = [1, 1]} : vector<16x2592xf32> to vector<16x72xf32>
    %34 = arith.maximumf %32, %33 : vector<16x72xf32>
    %35 = arith.maximumf %31, %34 : vector<16x72xf32>
    %36 = vector.broadcast %4 : vector<16x1xf32> to vector<16x72xf32>
    %37 = arith.addf %35, %36 : vector<16x72xf32>
    %cst_8 = arith.constant 0.000000e+00 : f32
    %38 = vector.broadcast %cst_8 : f32 to vector<16x72xf32>
    %39 = arith.maximumf %37, %38 : vector<16x72xf32>
    %40 = arith.truncf %39 : vector<16x72xf32> to vector<16x72xbf16>
    %41 = vector.extract_strided_slice %3 {offsets = [0, 216], sizes = [16, 72], strides = [1, 1]} : vector<16x2592xf32> to vector<16x72xf32>
    %42 = vector.extract_strided_slice %3 {offsets = [0, 864], sizes = [16, 72], strides = [1, 1]} : vector<16x2592xf32> to vector<16x72xf32>
    %43 = arith.maximumf %41, %42 : vector<16x72xf32>
    %44 = vector.extract_strided_slice %3 {offsets = [0, 1512], sizes = [16, 72], strides = [1, 1]} : vector<16x2592xf32> to vector<16x72xf32>
    %45 = vector.extract_strided_slice %3 {offsets = [0, 2160], sizes = [16, 72], strides = [1, 1]} : vector<16x2592xf32> to vector<16x72xf32>
    %46 = arith.maximumf %44, %45 : vector<16x72xf32>
    %47 = arith.maximumf %43, %46 : vector<16x72xf32>
    %48 = vector.broadcast %4 : vector<16x1xf32> to vector<16x72xf32>
    %49 = arith.addf %47, %48 : vector<16x72xf32>
    %cst_9 = arith.constant 0.000000e+00 : f32
    %50 = vector.broadcast %cst_9 : f32 to vector<16x72xf32>
    %51 = arith.maximumf %49, %50 : vector<16x72xf32>
    %52 = arith.truncf %51 : vector<16x72xf32> to vector<16x72xbf16>
    %53 = vector.extract_strided_slice %3 {offsets = [0, 288], sizes = [16, 72], strides = [1, 1]} : vector<16x2592xf32> to vector<16x72xf32>
    %54 = vector.extract_strided_slice %3 {offsets = [0, 936], sizes = [16, 72], strides = [1, 1]} : vector<16x2592xf32> to vector<16x72xf32>
    %55 = arith.maximumf %53, %54 : vector<16x72xf32>
    %56 = vector.extract_strided_slice %3 {offsets = [0, 1584], sizes = [16, 72], strides = [1, 1]} : vector<16x2592xf32> to vector<16x72xf32>
    %57 = vector.extract_strided_slice %3 {offsets = [0, 2232], sizes = [16, 72], strides = [1, 1]} : vector<16x2592xf32> to vector<16x72xf32>
    %58 = arith.maximumf %56, %57 : vector<16x72xf32>
    %59 = arith.maximumf %55, %58 : vector<16x72xf32>
    %60 = vector.broadcast %4 : vector<16x1xf32> to vector<16x72xf32>
    %61 = arith.addf %59, %60 : vector<16x72xf32>
    %cst_10 = arith.constant 0.000000e+00 : f32
    %62 = vector.broadcast %cst_10 : f32 to vector<16x72xf32>
    %63 = arith.maximumf %61, %62 : vector<16x72xf32>
    %64 = arith.truncf %63 : vector<16x72xf32> to vector<16x72xbf16>
    %65 = vector.extract_strided_slice %3 {offsets = [0, 360], sizes = [16, 72], strides = [1, 1]} : vector<16x2592xf32> to vector<16x72xf32>
    %66 = vector.extract_strided_slice %3 {offsets = [0, 1008], sizes = [16, 72], strides = [1, 1]} : vector<16x2592xf32> to vector<16x72xf32>
    %67 = arith.maximumf %65, %66 : vector<16x72xf32>
    %68 = vector.extract_strided_slice %3 {offsets = [0, 1656], sizes = [16, 72], strides = [1, 1]} : vector<16x2592xf32> to vector<16x72xf32>
    %69 = vector.extract_strided_slice %3 {offsets = [0, 2304], sizes = [16, 72], strides = [1, 1]} : vector<16x2592xf32> to vector<16x72xf32>
    %70 = arith.maximumf %68, %69 : vector<16x72xf32>
    %71 = arith.maximumf %67, %70 : vector<16x72xf32>
    %72 = vector.broadcast %4 : vector<16x1xf32> to vector<16x72xf32>
    %73 = arith.addf %71, %72 : vector<16x72xf32>
    %cst_11 = arith.constant 0.000000e+00 : f32
    %74 = vector.broadcast %cst_11 : f32 to vector<16x72xf32>
    %75 = arith.maximumf %73, %74 : vector<16x72xf32>
    %76 = arith.truncf %75 : vector<16x72xf32> to vector<16x72xbf16>
    %77 = vector.extract_strided_slice %3 {offsets = [0, 432], sizes = [16, 72], strides = [1, 1]} : vector<16x2592xf32> to vector<16x72xf32>
    %78 = vector.extract_strided_slice %3 {offsets = [0, 1080], sizes = [16, 72], strides = [1, 1]} : vector<16x2592xf32> to vector<16x72xf32>
    %79 = arith.maximumf %77, %78 : vector<16x72xf32>
    %80 = vector.extract_strided_slice %3 {offsets = [0, 1728], sizes = [16, 72], strides = [1, 1]} : vector<16x2592xf32> to vector<16x72xf32>
    %81 = vector.extract_strided_slice %3 {offsets = [0, 2376], sizes = [16, 72], strides = [1, 1]} : vector<16x2592xf32> to vector<16x72xf32>
    %82 = arith.maximumf %80, %81 : vector<16x72xf32>
    %83 = arith.maximumf %79, %82 : vector<16x72xf32>
    %84 = vector.broadcast %4 : vector<16x1xf32> to vector<16x72xf32>
    %85 = arith.addf %83, %84 : vector<16x72xf32>
    %cst_12 = arith.constant 0.000000e+00 : f32
    %86 = vector.broadcast %cst_12 : f32 to vector<16x72xf32>
    %87 = arith.maximumf %85, %86 : vector<16x72xf32>
    %88 = arith.truncf %87 : vector<16x72xf32> to vector<16x72xbf16>
    %89 = vector.extract_strided_slice %3 {offsets = [0, 504], sizes = [16, 72], strides = [1, 1]} : vector<16x2592xf32> to vector<16x72xf32>
    %90 = vector.extract_strided_slice %3 {offsets = [0, 1152], sizes = [16, 72], strides = [1, 1]} : vector<16x2592xf32> to vector<16x72xf32>
    %91 = arith.maximumf %89, %90 : vector<16x72xf32>
    %92 = vector.extract_strided_slice %3 {offsets = [0, 1800], sizes = [16, 72], strides = [1, 1]} : vector<16x2592xf32> to vector<16x72xf32>
    %93 = vector.extract_strided_slice %3 {offsets = [0, 2448], sizes = [16, 72], strides = [1, 1]} : vector<16x2592xf32> to vector<16x72xf32>
    %94 = arith.maximumf %92, %93 : vector<16x72xf32>
    %95 = arith.maximumf %91, %94 : vector<16x72xf32>
    %96 = vector.broadcast %4 : vector<16x1xf32> to vector<16x72xf32>
    %97 = arith.addf %95, %96 : vector<16x72xf32>
    %cst_13 = arith.constant 0.000000e+00 : f32
    %98 = vector.broadcast %cst_13 : f32 to vector<16x72xf32>
    %99 = arith.maximumf %97, %98 : vector<16x72xf32>
    %100 = arith.truncf %99 : vector<16x72xf32> to vector<16x72xbf16>
    %101 = vector.extract_strided_slice %3 {offsets = [0, 576], sizes = [16, 72], strides = [1, 1]} : vector<16x2592xf32> to vector<16x72xf32>
    %102 = vector.extract_strided_slice %3 {offsets = [0, 1224], sizes = [16, 72], strides = [1, 1]} : vector<16x2592xf32> to vector<16x72xf32>
    %103 = arith.maximumf %101, %102 : vector<16x72xf32>
    %104 = vector.extract_strided_slice %3 {offsets = [0, 1872], sizes = [16, 72], strides = [1, 1]} : vector<16x2592xf32> to vector<16x72xf32>
    %105 = vector.extract_strided_slice %3 {offsets = [0, 2520], sizes = [16, 72], strides = [1, 1]} : vector<16x2592xf32> to vector<16x72xf32>
    %106 = arith.maximumf %104, %105 : vector<16x72xf32>
    %107 = arith.maximumf %103, %106 : vector<16x72xf32>
    %108 = vector.broadcast %4 : vector<16x1xf32> to vector<16x72xf32>
    %109 = arith.addf %107, %108 : vector<16x72xf32>
    %cst_14 = arith.constant 0.000000e+00 : f32
    %110 = vector.broadcast %cst_14 : f32 to vector<16x72xf32>
    %111 = arith.maximumf %109, %110 : vector<16x72xf32>
    %112 = arith.truncf %111 : vector<16x72xf32> to vector<16x72xbf16>
    %113 = tpu.concatenate %16, %28, %40, %52, %64, %76, %88, %100, %112 in 0 : vector<16x72xbf16>, vector<16x72xbf16>, vector<16x72xbf16>, vector<16x72xbf16>, vector<16x72xbf16>, vector<16x72xbf16>, vector<16x72xbf16>, vector<16x72xbf16>, vector<16x72xbf16> -> vector<144x72xbf16>
    %c0_15 = arith.constant 0 : index
    %c0_16 = arith.constant 0 : index
    %114 = vector.load %arg4[%c0_15, %c0_16] : memref<16x144xbf16, #tpu.memory_space<vmem>>, vector<16x144xbf16>
    %cst_17 = arith.constant dense<0.000000e+00> : vector<16x72xf32>
    %115 = tpu.matmul %114, %113, %cst_17 {dimension_numbers = #tpu.dot_dimension_numbers<[1], [0], [0], [1], [0, 0, 1, 1], [], []>} : vector<16x144xbf16>, vector<144x72xbf16>, vector<16x72xf32> -> vector<16x72xf32>
    %116 = vector.extract_strided_slice %115 {offsets = [0, 0], sizes = [16, 18], strides = [1, 1]} : vector<16x72xf32> to vector<16x18xf32>
    %117 = vector.extract_strided_slice %115 {offsets = [0, 18], sizes = [16, 18], strides = [1, 1]} : vector<16x72xf32> to vector<16x18xf32>
    %118 = arith.maximumf %116, %117 : vector<16x18xf32>
    %119 = vector.extract_strided_slice %115 {offsets = [0, 36], sizes = [16, 18], strides = [1, 1]} : vector<16x72xf32> to vector<16x18xf32>
    %120 = vector.extract_strided_slice %115 {offsets = [0, 54], sizes = [16, 18], strides = [1, 1]} : vector<16x72xf32> to vector<16x18xf32>
    %121 = arith.maximumf %119, %120 : vector<16x18xf32>
    %122 = arith.maximumf %118, %121 : vector<16x18xf32>
    %c0_18 = arith.constant 0 : index
    %c0_19 = arith.constant 0 : index
    %123 = vector.load %arg5[%c0_18, %c0_19] : memref<16x1xf32, #tpu.memory_space<vmem>>, vector<16x1xf32>
    %124 = vector.broadcast %123 : vector<16x1xf32> to vector<16x18xf32>
    %125 = arith.addf %122, %124 : vector<16x18xf32>
    %cst_20 = arith.constant 0.000000e+00 : f32
    %126 = vector.broadcast %cst_20 : f32 to vector<16x18xf32>
    %127 = arith.maximumf %125, %126 : vector<16x18xf32>
    %128 = vector.extract_strided_slice %127 {offsets = [0, 0], sizes = [16, 2], strides = [1, 1]} : vector<16x18xf32> to vector<16x2xf32>
    %129 = vector.extract_strided_slice %127 {offsets = [0, 2], sizes = [16, 2], strides = [1, 1]} : vector<16x18xf32> to vector<16x2xf32>
    %130 = vector.extract_strided_slice %127 {offsets = [0, 4], sizes = [16, 2], strides = [1, 1]} : vector<16x18xf32> to vector<16x2xf32>
    %131 = vector.extract_strided_slice %127 {offsets = [0, 6], sizes = [16, 2], strides = [1, 1]} : vector<16x18xf32> to vector<16x2xf32>
    %132 = vector.extract_strided_slice %127 {offsets = [0, 8], sizes = [16, 2], strides = [1, 1]} : vector<16x18xf32> to vector<16x2xf32>
    %133 = vector.extract_strided_slice %127 {offsets = [0, 10], sizes = [16, 2], strides = [1, 1]} : vector<16x18xf32> to vector<16x2xf32>
    %134 = vector.extract_strided_slice %127 {offsets = [0, 12], sizes = [16, 2], strides = [1, 1]} : vector<16x18xf32> to vector<16x2xf32>
    %135 = vector.extract_strided_slice %127 {offsets = [0, 14], sizes = [16, 2], strides = [1, 1]} : vector<16x18xf32> to vector<16x2xf32>
    %136 = vector.extract_strided_slice %127 {offsets = [0, 16], sizes = [16, 2], strides = [1, 1]} : vector<16x18xf32> to vector<16x2xf32>
    %137 = tpu.concatenate %128, %129, %130, %131, %132, %133, %134, %135, %136 in 0 : vector<16x2xf32>, vector<16x2xf32>, vector<16x2xf32>, vector<16x2xf32>, vector<16x2xf32>, vector<16x2xf32>, vector<16x2xf32>, vector<16x2xf32>, vector<16x2xf32> -> vector<144x2xf32>
    %c0_21 = arith.constant 0 : index
    %c0_22 = arith.constant 0 : index
    %138 = vector.load %arg6[%c0_21, %c0_22] : memref<144x2xf32, #tpu.memory_space<vmem>>, vector<144x1xf32>
    %139 = vector.broadcast %138 : vector<144x1xf32> to vector<144x2xf32>
    %140 = arith.mulf %139, %137 : vector<144x2xf32>
    %cst_23 = arith.constant dense<0.000000e+00> : vector<2xf32>
    %141 = vector.multi_reduction <add>, %140, %cst_23 [0] : vector<144x2xf32> to vector<2xf32>
    %142 = vector.shape_cast %141 : vector<2xf32> to vector<1x2xf32>
    %c0_24 = arith.constant 0 : index
    %c1 = arith.constant 1 : index
    %143 = vector.load %arg6[%c0_24, %c1] : memref<144x2xf32, #tpu.memory_space<vmem>>, vector<144x1xf32>
    %144 = vector.broadcast %143 : vector<144x1xf32> to vector<144x2xf32>
    %145 = arith.mulf %144, %137 : vector<144x2xf32>
    %cst_25 = arith.constant dense<0.000000e+00> : vector<2xf32>
    %146 = vector.multi_reduction <add>, %145, %cst_25 [0] : vector<144x2xf32> to vector<2xf32>
    %147 = vector.shape_cast %146 : vector<2xf32> to vector<1x2xf32>
    %148 = tpu.concatenate %142, %147 in 0 : vector<1x2xf32>, vector<1x2xf32> -> vector<2x2xf32>
    %c0_26 = arith.constant 0 : index
    %c0_27 = arith.constant 0 : index
    %149 = vector.load %arg7[%c0_26, %c0_27] : memref<2x1xf32, #tpu.memory_space<vmem>>, vector<2x1xf32>
    %150 = vector.broadcast %149 : vector<2x1xf32> to vector<2x2xf32>
    %151 = arith.addf %148, %150 : vector<2x2xf32>
    %cst_28 = arith.constant 5.000000e-01 : f32
    %152 = vector.broadcast %cst_28 : f32 to vector<2x2xf32>
    %153 = arith.mulf %152, %151 : vector<2x2xf32>
    %154 = math.tanh %153 : vector<2x2xf32>
    %cst_29 = arith.constant 1.000000e+00 : f32
    %155 = vector.broadcast %cst_29 : f32 to vector<2x2xf32>
    %156 = arith.addf %154, %155 : vector<2x2xf32>
    %cst_30 = arith.constant 5.000000e-01 : f32
    %157 = vector.broadcast %cst_30 : f32 to vector<2x2xf32>
    %158 = arith.mulf %157, %156 : vector<2x2xf32>
    %c0_31 = arith.constant 0 : index
    %c0_32 = arith.constant 0 : index
    %c0_33 = arith.constant 0 : index
    %159 = vector.load %arg8[%c0_31, %c0_32, %c0_33] : memref<1x2x2xf32, #tpu.memory_space<vmem>>, vector<1x2x2xf32>
    %160 = vector.shape_cast %159 : vector<1x2x2xf32> to vector<2x2xf32>
    %161 = vector.shape_cast %158 : vector<2x2xf32> to vector<1x2x2xf32>
    tpu.vector_store %arg8[%c0_31, %c0_32, %c0_33], %161 {strides = array<i32>} : memref<1x2x2xf32, #tpu.memory_space<vmem>>, vector<1x2x2xf32>,
    return
  }
  func.func @transform_0(%arg0: i32) -> (i32, i32, i32) {
    %c0_i32 = arith.constant 0 : i32
    %c0_i32_0 = arith.constant 0 : i32
    %c0_i32_1 = arith.constant 0 : i32
    return %arg0, %c0_i32, %c0_i32_0 : i32, i32, i32
  }
  func.func @transform_1(%arg0: i32) -> (i32, i32) {
    %c0_i32 = arith.constant 0 : i32
    %c0_i32_0 = arith.constant 0 : i32
    %c0_i32_1 = arith.constant 0 : i32
    return %c0_i32, %c0_i32_0 : i32, i32
  }
  func.func @transform_2(%arg0: i32) -> (i32, i32) {
    %c0_i32 = arith.constant 0 : i32
    %c0_i32_0 = arith.constant 0 : i32
    %c0_i32_1 = arith.constant 0 : i32
    return %c0_i32, %c0_i32_0 : i32, i32
  }
  func.func @transform_3(%arg0: i32) -> (i32, i32) {
    %c0_i32 = arith.constant 0 : i32
    %c0_i32_0 = arith.constant 0 : i32
    %c0_i32_1 = arith.constant 0 : i32
    return %c0_i32, %c0_i32_0 : i32, i32
  }
  func.func @transform_4(%arg0: i32) -> (i32, i32) {
    %c0_i32 = arith.constant 0 : i32
    %c0_i32_0 = arith.constant 0 : i32
    %c0_i32_1 = arith.constant 0 : i32
    return %c0_i32, %c0_i32_0 : i32, i32
  }
  func.func @transform_5(%arg0: i32) -> (i32, i32) {
    %c0_i32 = arith.constant 0 : i32
    %c0_i32_0 = arith.constant 0 : i32
    %c0_i32_1 = arith.constant 0 : i32
    return %c0_i32, %c0_i32_0 : i32, i32
  }
  func.func @transform_6(%arg0: i32) -> (i32, i32) {
    %c0_i32 = arith.constant 0 : i32
    %c0_i32_0 = arith.constant 0 : i32
    %c0_i32_1 = arith.constant 0 : i32
    return %c0_i32, %c0_i32_0 : i32, i32
  }
  func.func @transform_7(%arg0: i32) -> (i32, i32, i32) {
    %c0_i32 = arith.constant 0 : i32
    %c0_i32_0 = arith.constant 0 : i32
    %c0_i32_1 = arith.constant 0 : i32
    return %arg0, %c0_i32, %c0_i32_0 : i32, i32, i32
  }
}

</mosaic_0001>

<bundles_post_ra>
// kernel: cnn_forward.1
= control target key start
LH: loop header
LB: loop body
LE: loop exit
PB: predicated region body
PF: predicated region fallthrough
CT: control target
= control target key end

     0   :  { %v1811_v1 = vmov 0   ;;  %vm290_vm0 = vcmask 261120   ;;  %v1812_v43 = vmov 0.0   ;;  %vm1813_vm1 = vmmov 0   ;;  %s1816_s19 = smov 8   ;;  %s1817_s20 = smov 80   ;;  %s2466_s0 = inlined_call_operand.vmem [shape: bf16[1,32,2592], index: 0, kind: input, shape index: {}]   ;;  %s2467_s1 = inlined_call_operand.vmem [shape: bf16[16,32], index: 1, kind: input, shape index: {}]   ;;  %s2468_s2 = inlined_call_operand.vmem [shape: f32[16,1], index: 2, kind: input, shape index: {}]   ;;  %s2469_s3 = inlined_call_operand.vmem [shape: bf16[16,144], index: 3, kind: input, shape index: {}]   ;;  %s2470_s4 = inlined_call_operand.vmem [shape: f32[16,1], index: 4, kind: input, shape index: {}]   ;;  %s2471_s5 = inlined_call_operand.vmem [shape: f32[144,2], index: 5, kind: input, shape index: {}]   ;;  %s2472_s6 = inlined_call_operand.vmem [shape: f32[2,1], index: 6, kind: input, shape index: {}]   ;;  %s2473_s7 = inlined_call_operand.vmem [shape: f32[1,2,2], index: 7, kind: output, shape index: {}]  }
   0x1   :  { %v1743_v0 = vld [vmem:[%s2466_s0 + $0xac] ss:$84 sps:$4 sm:$0xff]   ;;  %326 = vmatprep.mubr.bf16.mxu0 %v1811_v1  ;;  %541 = vmatprep.mubr.bf16.mxu1 %v1811_v1  ;;  %v1745_v2 = vld [vmem:[%s2466_s0 + $0xd4] ss:$84 sps:$4 sm:$0xff]   ;;  %v1748_v4 = vld [vmem:[%s2466_s0 + $0xd0] ss:$84 sps:$4 sm:$0xff]  }
   0x2   :  { %1737 = vset.pattern.permute.xlu0 %v1811_v1  ;;  %1738 = vset.pattern.permute.xlu1 %v1811_v1  ;;  %v1747_v3 = vld [vmem:[%s2466_s0 + $0xa8] ss:$84 sps:$4 sm:$0xff]   ;;  %v1749_v5 = vld [vmem:[%s2466_s0 + $0x4] ss:$84 sps:$4 sm:$0xff]   ;;  %v1751_v6 = vld [vmem:[%s2466_s0 + $0x2c] ss:$84 sps:$4 sm:$0xff]  }
   0x3   :  { %306 = vmatprep.subr.bf16.mxu0 %v1743_v0  ;;  %521 = vmatprep.subr.bf16.mxu1 %v1745_v2  ;;  %v1753_v7 = vld [vmem:[%s2466_s0] ss:$84 sps:$4 sm:$0xff]   ;;  %v1754_v8 = vld [vmem:[%s2466_s0 + $0x28] ss:$84 sps:$4 sm:$0xff]   ;;  %v1756_v10 = vld [vmem:[%s2466_s0 + $0xb0] ss:$84 sps:$4 sm:$0xff]  }
   0x4   :  { %307 = vmatpush1.bf16.msra.mxu0 %v1747_v3  ;;  %522 = vmatpush1.bf16.msra.mxu1 %v1748_v4  ;;  %v1903_v9 = vld [vmem:[%s2467_s1] sm:$0xff]   ;;  %v1758_v11 = vld [vmem:[%s2466_s0 + $0xb4] ss:$84 sps:$4 sm:$0xff]   ;;  %v1767_v15 = vld [vmem:[%s2466_s0 + $0x3c] ss:$84 sps:$4 sm:$0xff]   ;;  %vm818_vm2 = vcmask 982016  }
   0x5   :  { %308 = vmatprep.subr.bf16.mxu0 %v1749_v5  ;;  %523 = vmatprep.subr.bf16.mxu1 %v1751_v6  ;;  %v1759_v12 = vld [vmem:[%s2466_s0 + $0xe0] ss:$84 sps:$4 sm:$0xff]   ;;  %v1761_v13 = vld [vmem:[%s2466_s0 + $0xe4] ss:$84 sps:$4 sm:$0xff]   ;;  %v1762_v16 = vld [vmem:[%s2466_s0 + $0x8] ss:$84 sps:$4 sm:$0xff]  }
   0x6   :  { %v1764_v14 = vld [vmem:[%s2466_s0 + $0xc] ss:$84 sps:$4 sm:$0xff]   ;;  %v1770_v18 = vld [vmem:[%s2466_s0 + $0xbc] ss:$84 sps:$4 sm:$0xff]   ;;  %v1773_v19 = vld [vmem:[%s2466_s0 + $0xf4] ss:$84 sps:$4 sm:$0xff]  }
   0x7   :  { %v1765_v17 = vld [vmem:[%s2466_s0 + $0x38] ss:$84 sps:$4 sm:$0xff]   ;;  %v1771_v21 = vld [vmem:[%s2466_s0 + $0xf0] ss:$84 sps:$4 sm:$0xff]   ;;  %v1776_v22 = vld [vmem:[%s2466_s0 + $0x14] ss:$84 sps:$4 sm:$0xff]  }
   0x8   :  { %309 = vmatpush1.bf16.msra.mxu0 %v1753_v7  ;;  %524 = vmatpush1.bf16.msra.mxu1 %v1754_v8  ;;  %v1768_v20 = vld [vmem:[%s2466_s0 + $0xb8] ss:$84 sps:$4 sm:$0xff]   ;;  %v1774_v24 = vld [vmem:[%s2466_s0 + $0x10] ss:$84 sps:$4 sm:$0xff]   ;;  %v1777_v25 = vld [vmem:[%s2466_s0 + $0x48] ss:$84 sps:$4 sm:$0xff]  }
   0x9   :  { %349 = vmatprep.subr.bf16.mxu0 %v1758_v11  ;;  %607 = vmatprep.subr.bf16.mxu1 %v1761_v13  ;;  %v1779_v23 = vld [vmem:[%s2466_s0 + $0x4c] ss:$84 sps:$4 sm:$0xff]   ;;  %v1782_v26 = vld [vmem:[%s2466_s0 + $0xc4] ss:$84 sps:$4 sm:$0xff]   ;;  %v1785_v28 = vld [vmem:[%s2466_s0 + $0x1c] ss:$84 sps:$4 sm:$0xff]  }
   0xa   :  { %v1780_v27 = vld [vmem:[%s2466_s0 + $0xc0] ss:$84 sps:$4 sm:$0xff]   ;;  %v1783_v29 = vld [vmem:[%s2466_s0 + $0x18] ss:$84 sps:$4 sm:$0xff]   ;;  %v1786_v31 = vld [vmem:[%s2466_s0 + $0xc8] ss:$84 sps:$4 sm:$0xff]  }
   0xb   :  { %1691 = vmatmul.mubr.msk.bf16.vlgmr.msra.gmra.mxu0 %vm290_vm0, %v1903_v9  ;;  %1696 = vmatmul.mubr.msk.bf16.vlgmr.msra.gmra.mxu1 %vm290_vm0, %v1903_v9  ;;  %v1788_v30 = vld [vmem:[%s2466_s0 + $0xcc] ss:$84 sps:$4 sm:$0xff]   ;;  %v1791_v32 = vld [vmem:[%s2466_s0 + $0x24] ss:$84 sps:$4 sm:$0xff]   ;;  %v1794_v34 = vld [vmem:[%s2466_s0 + $0xdc] ss:$84 sps:$4 sm:$0xff]  }
   0xc   :  { %350 = vmatpush1.bf16.msra.mxu0 %v1756_v10  ;;  %608 = vmatpush1.bf16.msra.mxu1 %v1759_v12  ;;  %v1789_v33 = vld [vmem:[%s2466_s0 + $0x20] ss:$84 sps:$4 sm:$0xff]   ;;  %v1792_v35 = vld [vmem:[%s2466_s0 + $0xd8] ss:$84 sps:$4 sm:$0xff]   ;;  %v1795_v37 = vld [vmem:[%s2466_s0 + $0x30] ss:$84 sps:$4 sm:$0xff]  }
   0xd   :  { %351 = vmatprep.subr.bf16.mxu0 %v1764_v14  ;;  %609 = vmatprep.subr.bf16.mxu1 %v1767_v15  ;;  %v1797_v36 = vld [vmem:[%s2466_s0 + $0x34] ss:$84 sps:$4 sm:$0xff]   ;;  %v1800_v38 = vld [vmem:[%s2466_s0 + $0xec] ss:$84 sps:$4 sm:$0xff]   ;;  %v1803_v40 = vld [vmem:[%s2466_s0 + $0x44] ss:$84 sps:$4 sm:$0xff]  }
   0xe   :  { %369 = vmatprep.mubr.bf16.mxu0 %v1811_v1  ;;  %627 = vmatprep.mubr.bf16.mxu1 %v1811_v1  ;;  %v1798_v39 = vld [vmem:[%s2466_s0 + $0xe8] ss:$84 sps:$4 sm:$0xff]   ;;  %v1801_v41 = vld [vmem:[%s2466_s0 + $0x40] ss:$84 sps:$4 sm:$0xff]   ;;  %v1804_v42 = vld [vmem:[%s2466_s0 + $0xf8] ss:$84 sps:$4 sm:$0xff]  }
   0xf   :  { %v1805_v44 = vld [vmem:[%s2466_s0 + $0x50] ss:$84 sps:$4 sm:$0xff]   ;;  %s1814_s0 = smov 120   ;;  %vm857_vm3 = vcmask 916480   ;;  %s1818_s21 = smov 24   ;;  %vm1199_vm4 = vcmask 130048  }
  0x10   :  { %352 = vmatpush1.bf16.msra.mxu0 %v1762_v16  ;;  %610 = vmatpush1.bf16.msra.mxu1 %v1765_v17  ;;  %s1819_s22 = smov 96   ;;  %s1820_s23 = smov 40   ;;  %vm1176_vm5 = vcmask 64512   ;;  %vm1163_vm6 = vcmask 195584   ;;  %vm1151_vm7 = vcmask 326656   ;;  %vm1139_vm8 = vcmask 457728  }
  0x11   :  { %392 = vmatprep.subr.bf16.mxu0 %v1770_v18  ;;  %693 = vmatprep.subr.bf16.mxu1 %v1773_v19  ;;  %s1821_s26 = smov 56   ;;  %s1822_s1 = smov 64   ;;  %vm1185_vm9 = vcmask 523264   ;;  %vm1456_vm10 = vcmask 15360   ;;  %vm1629_vm11 = vcmask 1040384   ;;  %vm1642_vm12 = vcmask 9216  }
  0x12   :  { %s1823_s29 = smov 110   ;;  %s1826_s18 = smov 126  }
  0x13   :  { %1692 = vmatmul.mubr.msk.bf16.vlgmr.msra.gmra.mxu0 %vm290_vm0, %v1903_v9  ;;  %1698 = vmatmul.mubr.msk.bf16.vlgmr.msra.gmra.mxu1 %vm290_vm0, %v1903_v9 }
  0x14   :  { %393 = vmatpush1.bf16.msra.mxu0 %v1768_v20  ;;  %694 = vmatpush1.bf16.msra.mxu1 %v1771_v21 }
  0x15   :  { %394 = vmatprep.subr.bf16.mxu0 %v1776_v22  ;;  %695 = vmatprep.subr.bf16.mxu1 %v1779_v23 }
  0x16   :  { %412 = vmatprep.mubr.bf16.mxu0 %v1811_v1  ;;  %713 = vmatprep.mubr.bf16.mxu1 %v1811_v1 }
  0x18   :  { %395 = vmatpush1.bf16.msra.mxu0 %v1774_v24  ;;  %696 = vmatpush1.bf16.msra.mxu1 %v1777_v25  ;;  %v765_v24 = vld [vmem:[%s2468_s2] sm:$0xff] }
  0x19   :  { %435 = vmatprep.subr.bf16.mxu0 %v1782_v26  ;;  %1203 = vmatprep.subr.bf16.mxu1 %v1811_v1 }
  0x1b   :  { %1693 = vmatmul.mubr.msk.bf16.vlgmr.msra.gmra.mxu0 %vm290_vm0, %v1903_v9  ;;  %1700 = vmatmul.mubr.msk.bf16.vlgmr.msra.gmra.mxu1 %vm290_vm0, %v1903_v9 }
  0x1c   :  { %436 = vmatpush1.bf16.msra.mxu0 %v1780_v27  ;;  %455 = vmatprep.mubr.bf16.mxu0 %v1811_v1  ;;  %v766_v27 = vld [vmem:[%s2468_s2 + $0x8] sm:$0xff]  ;;  %s1815_s2 = smov 112  }
  0x1d   :  { %437 = vmatprep.subr.bf16.mxu0 %v1785_v28 }
  0x20   :  { %438 = vmatpush1.bf16.msra.mxu0 %v1783_v29 }
  0x21   :  { %478 = vmatprep.subr.bf16.mxu0 %v1788_v30 }
  0x23   :  { %1694 = vmatmul.mubr.msk.bf16.vlgmr.msra.gmra.mxu0 %vm290_vm0, %v1903_v9 }
  0x24   :  { %479 = vmatpush1.bf16.msra.mxu0 %v1786_v31  ;;  %498 = vmatprep.mubr.bf16.mxu0 %v1811_v1 }
  0x25   :  { %480 = vmatprep.subr.bf16.mxu0 %v1791_v32 }
  0x28   :  { %481 = vmatpush1.bf16.msra.mxu0 %v1789_v33 }
  0x29   :  { %564 = vmatprep.subr.bf16.mxu0 %v1794_v34 }
  0x2b   :  { %1695 = vmatmul.mubr.msk.bf16.vlgmr.msra.gmra.mxu0 %vm290_vm0, %v1903_v9 }
  0x2c   :  { %565 = vmatpush1.bf16.msra.mxu0 %v1792_v35  ;;  %584 = vmatprep.mubr.bf16.mxu0 %v1811_v1 }
  0x2d   :  { %566 = vmatprep.subr.bf16.mxu0 %v1797_v36 }
  0x30   :  { %567 = vmatpush1.bf16.msra.mxu0 %v1795_v37 }
  0x31   :  { %650 = vmatprep.subr.bf16.mxu0 %v1800_v38 }
  0x33   :  { %1697 = vmatmul.mubr.msk.bf16.vlgmr.msra.gmra.mxu0 %vm290_vm0, %v1903_v9 }
  0x34   :  { %651 = vmatpush1.bf16.msra.mxu0 %v1798_v39  ;;  %670 = vmatprep.mubr.bf16.mxu0 %v1811_v1 }
  0x35   :  { %652 = vmatprep.subr.bf16.mxu0 %v1803_v40 }
  0x38   :  { %653 = vmatpush1.bf16.msra.mxu0 %v1801_v41 }
  0x39   :  { %1708 = vmatprep.subr.bf16.mxu0 %v1812_v43 }
  0x3b   :  { %1699 = vmatmul.mubr.msk.bf16.vlgmr.msra.gmra.mxu0 %vm290_vm0, %v1903_v9 }
  0x3c   :  { %1709 = vmatpush3.bf16.msra.mxu0 %v1804_v42  ;;  %1712 = vmatprep.mubr.msk.bf16.mxu0 %vm1813_vm1, %v1812_v43 }
  0x3d   :  { %1710 = vmatprep.subr.bf16.mxu0 %v1812_v43 }
  0x40   :  { %1711 = vmatpush3.bf16.msra.mxu0 %v1805_v44 }
  0x43   :  { %1713 = vmatmul.mubr.msk.bf16.vlgmr.msra.gmra.mxu0 %vm290_vm0, %v1903_v9 }
  0xcb   :  { %v2038_v45 = vpop.f32.mrf.mxu0  ;;  %v2040_v46 = vpop.f32.mrf.mxu1 }
  0xcd   :  { %v2042_v47 = vpop.f32.mrf.mxu0  ;;  %v2044_v48 = vpop.f32.mrf.mxu1 }
  0xcf   :  { %v2046_v49 = vpop.f32.mrf.mxu0  ;;  %v2048_v50 = vpop.f32.mrf.mxu1 }
  0xd1   :  { %v2050_v51 = vpop.f32.mrf.mxu0  ;;  %v2052_v52 = vpop.f32.mrf.mxu1 }
  0xd3   :  { %v2054_v53 = vpop.f32.mrf.mxu0  ;;  %v2056_v54 = vpop.f32.mrf.mxu1 }
  0xd5   :  { %v2058_v55 = vpop.f32.mrf.mxu0  ;;  %v2060_v56 = vpop.f32.mrf.mxu1 }
  0xd7   :  { %v2062_v57 = vpop.f32.mrf.mxu0  ;;  %v2064_v58 = vpop.f32.mrf.mxu1 }
  0xd9   :  { %v2066_v59 = vpop.f32.mrf.mxu0  ;;  %v2068_v60 = vpop.f32.mrf.mxu1 }
  0xdb   :  { %v2070_v61 = vpop.f32.mrf.mxu0  ;;  %v715_v62 = vpop.f32.mrf.mxu1 }
  0xdc   :  { %960 = vrot.lane.b32.xlu1 %v715_v62, %s1814_s0 }
  0xdd   :  { %v2073_v63 = vpop.f32.mrf.mxu0  ;;  %v717_v0 = vpop.f32.mrf.mxu1 }
  0xde   :  { %1004 = vrot.lane.b32.xlu0 %v717_v0, %s1814_s0 }
  0xdf   :  { %v2076_v2 = vpop.f32.mrf.mxu0  ;;  %v719_v3 = vpop.f32.mrf.mxu1 }
  0xe0   :  { %962 = vrot.lane.b32.xlu1 %v719_v3, %s1814_s0 }
  0xe1   :  { %v2079_v4 = vpop.f32.mrf.mxu0  ;;  %v721_v5 = vpop.f32.mrf.mxu1 }
  0xe2   :  { %1006 = vrot.lane.b32.xlu0 %v721_v5, %s1814_s0 }
  0xe3   :  { %v457_v6 = vpop.f32.mrf.mxu0 }
  0xe5   :  { %v459_v7 = vpop.f32.mrf.mxu0 }
  0xe7   :  { %v461_v8 = vpop.f32.mrf.mxu0 }
  0xe9   :  { %v463_v9 = vpop.f32.mrf.mxu0 }
  0xeb   :  { %v500_v10 = vpop.f32.mrf.mxu0 }
  0xed   :  { %v502_v11 = vpop.f32.mrf.mxu0 }
  0xef   :  { %v504_v12 = vpop.f32.mrf.mxu0 }
  0xf1   :  { %v506_v13 = vpop.f32.mrf.mxu0 }
  0xf3   :  { %v2082_v14 = vpop.f32.mrf.mxu0 }
  0xf5   :  { %v588_v15 = vpop.f32.mrf.mxu0 }
  0xf7   :  { %v2084_v16 = vpop.f32.mrf.mxu0 }
  0xf9   :  { %v592_v17 = vpop.f32.mrf.mxu0 }
  0xfb   :  { %v672_v18 = vpop.f32.mrf.mxu0 }
  0xfd   :  { %v674_v19 = vpop.f32.mrf.mxu0 }
  0xfe   :  { %896 = vrot.lane.b32.xlu0 %v674_v19, %s1814_s0 }
  0xff   :  { %v676_v20 = vpop.f32.mrf.mxu0 }
 0x101   :  { %v678_v21 = vpop.f32.mrf.mxu0 }
 0x102   :  { %831 = vrot.lane.b32.xlu0 %v672_v18, %s1814_s0  ;;  %898 = vrot.lane.b32.xlu1 %v678_v21, %s1814_s0 }
 0x103   :  { %v758_v22 = vpop.f32.mrf.mxu0 }
 0x105   :  { %v1714_v23 = vpop.f32.mrf.mxu0 }
 0x106   :  { %779 = vrot.lane.b32.xlu0 %v2060_v56, %s1814_s0  ;;  %833 = vrot.lane.b32.xlu1 %v676_v20, %s1814_s0 }
 0x107   :  { %v761_v25 = vpop.f32.mrf.mxu0 }
 0x109   :  { %v1715_v26 = vpop.f32.mrf.mxu0 }
 0x10a   :  { %799 = vperm.xlu0 %1737, %v765_v24   ;;  %781 = vrot.lane.b32.xlu1 %v2068_v60, %s1814_s0 }
 0x10e   :  { %804 = vperm.xlu1 %1738, %v766_v27   ;;  %1087 = vrot.lane.b32.xlu0 %v758_v22, %s1814_s0 }
 0x112   :  { %1045 = vrot.lane.b32.xlu0 %v506_v13, %s1814_s0  ;;  %1089 = vrot.lane.b32.xlu1 %v761_v25, %s1814_s0 }
 0x116   :  { %946 = vrot.lane.b32.xlu0 %v504_v12, %s1814_s0  ;;  %1043 = vrot.lane.b32.xlu1 %v502_v11, %s1814_s0 }
 0x11a   :  { %882 = vrot.lane.b32.xlu0 %v463_v9, %s1814_s0  ;;  %944 = vrot.lane.b32.xlu1 %v500_v10, %s1814_s0 }
 0x11e   :  { %816 = vrot.lane.b32.xlu0 %v461_v8, %s1814_s0  ;;  %880 = vrot.lane.b32.xlu1 %v459_v7, %s1814_s0 }
 0x122   :  { %771 = vrot.lane.b32.xlu0 %v2079_v4, %s1814_s0  ;;  %814 = vrot.lane.b32.xlu1 %v457_v6, %s1814_s0 }
 0x126   :  { %769 = vrot.lane.b32.xlu1 %v2073_v63, %s1814_s0 }
 0x14e   :  { %v961_v28 = vpop.permute.xlu1 %960 }
 0x14f   :  { %v967_v29 = vmax.f32 %v588_v15, %v961_v28  ;;  %v966_v30 = vmax.f32 %v2082_v14, %v961_v28 }
 0x150   :  { %v1005_v31 = vpop.permute.xlu0 %1004 }
 0x151   :  { %976 = vrot.lane.b32.xlu0 %v967_v29, %s1815_s2  ;;  %974 = vrot.lane.b32.xlu1 %v966_v30, %s1815_s2  ;;  %v1015_v34 = vmax.f32 %v2056_v54, %v1005_v31  ;;  %v1008_v36 = vsel %vm818_vm2, %v961_v28, %v1005_v31 }
 0x152   :  { %v963_v32 = vpop.permute.xlu1 %962  ;;  %v1014_v38 = vmax.f32 %v588_v15, %v1008_v36 }
 0x153   :  { %v969_v33 = vmax.f32 %v592_v17, %v963_v32  ;;  %v968_v41 = vmax.f32 %v2084_v16, %v963_v32 }
 0x154   :  { %v1007_v35 = vpop.permute.xlu0 %1006 }
 0x155   :  { %980 = vrot.lane.b32.xlu0 %v969_v33, %s1815_s2  ;;  %1024 = vrot.lane.b32.xlu1 %v1015_v34, %s1815_s2  ;;  %v1017_v37 = vmax.f32 %v2064_v58, %v1007_v35  ;;  %v1009_v39 = vsel %vm818_vm2, %v963_v32, %v1007_v35 }
 0x156   :  { %v1016_v40 = vmax.f32 %v592_v17, %v1009_v39 }
 0x159   :  { %1028 = vrot.lane.b32.xlu0 %v1017_v37, %s1815_s2  ;;  %1022 = vrot.lane.b32.xlu1 %v1014_v38, %s1815_s2 }
 0x15d   :  { %1026 = vrot.lane.b32.xlu0 %v1016_v40, %s1815_s2  ;;  %978 = vrot.lane.b32.xlu1 %v968_v41, %s1815_s2 }
 0x170   :  { %v897_v42 = vpop.permute.xlu0 %896 }
 0x171   :  { %v907_v3 = vmax.f32 %v2082_v14, %v897_v42 }
 0x174   :  { %v832_v43 = vpop.permute.xlu0 %831  ;;  %v899_v44 = vpop.permute.xlu1 %898 }
 0x175   :  { %v842_v62 = vmax.f32 %v2044_v48, %v832_v43  ;;  %v900_v6 = vsel %vm818_vm2, %v832_v43, %v897_v42  ;;  %v909_v8 = vmax.f32 %v2084_v16, %v899_v44 }
 0x176   :  { %v906_v9 = vmax.f32 %v2044_v48, %v900_v6 }
 0x177   :  { %851 = vrot.lane.b32.xlu1 %v842_v62, %s1815_s2 }
 0x178   :  { %v834_v0 = vpop.permute.xlu1 %833  ;;  %v2133_v7 = vpop.permute.xlu0 %779 }
 0x179   :  { %v844_v5 = vmax.f32 %v2052_v52, %v834_v0  ;;  %v835_v10 = vsel %vm818_vm2, %v2133_v7, %v832_v43  ;;  %v901_v11 = vsel %vm818_vm2, %v834_v0, %v899_v44 }
 0x17a   :  { %v908_v13 = vmax.f32 %v2052_v52, %v901_v11  ;;  %v841_v14 = vmax.f32 %v2040_v46, %v835_v10 }
 0x17b   :  { %855 = vrot.lane.b32.xlu0 %v844_v5, %s1815_s2  ;;  %916 = vrot.lane.b32.xlu1 %v907_v3, %s1815_s2 }
 0x17c   :  { %v2142_v12 = vpop.permute.xlu1 %781 }
 0x17d   :  { %v836_v15 = vsel %vm818_vm2, %v2142_v12, %v834_v0 }
 0x17e   :  { %v843_v16 = vmax.f32 %v2048_v50, %v836_v15 }
 0x17f   :  { %920 = vrot.lane.b32.xlu0 %v909_v8, %s1815_s2  ;;  %914 = vrot.lane.b32.xlu1 %v906_v9, %s1815_s2 }
 0x183   :  { %918 = vrot.lane.b32.xlu0 %v908_v13, %s1815_s2  ;;  %849 = vrot.lane.b32.xlu1 %v841_v14, %s1815_s2 }
 0x185   :  { %v2152_v48 = vpop.permute.xlu0 %799 }
 0x187   :  { %853 = vrot.lane.b32.xlu0 %v843_v16, %s1815_s2  ;;  %1071 = vrot.lane.b32.xlu1 %v2040_v46, %s1814_s0 }
 0x189   :  { %v2158_v17 = vpop.permute.xlu1 %804  ;;  %v1088_v52 = vpop.permute.xlu0 %1087 }
 0x18a   :  { %v1091_v18 = vsel %vm818_vm2, %v1005_v31, %v1088_v52  ;;  %v1098_v20 = vmax.f32 %v2060_v56, %v1088_v52 }
 0x18b   :  { %1073 = vrot.lane.b32.xlu0 %v2048_v50, %s1814_s0  ;;  %v1097_v19 = vmax.f32 %v2056_v54, %v1091_v18 }
 0x18d   :  { %1105 = vrot.lane.b32.xlu1 %v1097_v19, %s1815_s2  ;;  %v1090_v21 = vpop.permute.xlu1 %1089  ;;  %v2172_v25 = vpop.permute.xlu0 %1045 }
 0x18e   :  { %v1092_v22 = vsel %vm818_vm2, %v1007_v35, %v1090_v21  ;;  %v1100_v24 = vmax.f32 %v2068_v60, %v1090_v21  ;;  %v1051_v42 = vmax.f32 %v2066_v59, %v2172_v25  ;;  %v1052_v43 = vmax.f32 %v2076_v2, %v2172_v25 }
 0x18f   :  { %1107 = vrot.lane.b32.xlu0 %v1098_v20, %s1815_s2  ;;  %v1099_v23 = vmax.f32 %v2064_v58, %v1092_v22 }
 0x191   :  { %1109 = vrot.lane.b32.xlu1 %v1099_v23, %s1815_s2  ;;  %v2174_v54 = vpop.permute.xlu1 %1043  ;;  %v947_v56 = vpop.permute.xlu0 %946 }
 0x192   :  { %v1049_v33 = vmax.f32 %v2058_v55, %v2174_v54  ;;  %v1050_v34 = vmax.f32 %v2070_v61, %v2174_v54  ;;  %v957_v10 = vmax.f32 %v2066_v59, %v947_v56 }
 0x193   :  { %1111 = vrot.lane.b32.xlu0 %v1100_v24, %s1815_s2 }
 0x195   :  { %v945_v26 = vpop.permute.xlu1 %944  ;;  %v2176_v27 = vpop.permute.xlu0 %882 }
 0x196   :  { %v955_v40 = vmax.f32 %v2058_v55, %v945_v26  ;;  %v949_v6 = vsel %vm818_vm2, %v2176_v27, %v947_v56 }
 0x197   :  { %v956_v16 = vmax.f32 %v2062_v57, %v949_v6  ;;  %v785_v6 = vmax.f32 %v2040_v46, %v2133_v7 }
 0x199   :  { %v2178_v28 = vpop.permute.xlu1 %880  ;;  %v2180_v29 = vpop.permute.xlu0 %816 }
 0x19a   :  { %v948_v37 = vsel %vm818_vm2, %v2178_v28, %v945_v26  ;;  %v885_v7 = vsel %vm818_vm2, %v2180_v29, %v2176_v27 }
 0x19b   :  { %v954_v44 = vmax.f32 %v2054_v53, %v948_v37 }
 0x19d   :  { %v2182_v30 = vpop.permute.xlu1 %814  ;;  %v2184_v58 = vpop.permute.xlu0 %771 }
 0x1a1   :  { %v2186_v60 = vpop.permute.xlu1 %769 }
 0x1c3   :  { %v977_v31 = vpop.permute.xlu0 %976  ;;  %v975_v32 = vpop.permute.xlu1 %974 }
 0x1c4   :  { %v982_v41 = vsel %vm857_vm3, %v975_v32, %v977_v31  ;;  %v989_v52 = vmax.f32 %v955_v40, %v977_v31 }
 0x1c5   :  { %v988_v11 = vmax.f32 %v954_v44, %v982_v41 }
 0x1c7   :  { %v981_v35 = vpop.permute.xlu0 %980  ;;  %v1025_v36 = vpop.permute.xlu1 %1024  ;;  %v992_v56 = vadd.f32 %v988_v11, %v2152_v48 }
 0x1c8   :  { %v1055_v38 = vmax.f32 %v1049_v33, %v1025_v36  ;;  %v1056_v39 = vmax.f32 %v1050_v34, %v1025_v36  ;;  %v991_v18 = vmax.f32 %v957_v10, %v981_v35 }
 0x1ca   :  { %v1059_v62 = vadd.f32 %v1055_v38, %v2152_v48  ;;  %v1060_v0 = vadd.f32 %v1056_v39, %v2152_v48  ;;  %v995_v31 = vadd.f32 %v991_v18, %v2158_v17 }
 0x1cb   :  { %v1029_v3 = vpop.permute.xlu0 %1028  ;;  %v1023_v5 = vpop.permute.xlu1 %1022 }
 0x1cc   :  { %v1057_v55 = vmax.f32 %v1051_v42, %v1029_v3  ;;  %v1058_v8 = vmax.f32 %v1052_v43, %v1029_v3  ;;  %v1030_v9 = vsel %vm857_vm3, %v1023_v5, %v1025_v36  ;;  %v1064_v21 = vmax.f32 %v1060_v0, 0.0 }
 0x1cd   :  { %v1034_v13 = vmax.f32 %v955_v40, %v1030_v9  ;;  %v1063_v22 = vmax.f32 %v1059_v62, 0.0  ;;  %v993_v40 = vadd.f32 %v989_v52, %v2152_v48  ;;  %v999_v44 = vmax.f32 %v995_v31, 0.0 }
 0x1ce   :  { %v1061_v14 = vadd.f32 %v1057_v55, %v2158_v17  ;;  %v1062_v15 = vadd.f32 %v1058_v8, %v2158_v17  ;;  %v891_v8 = vmax.f32 %v2054_v53, %v2178_v28 }
 0x1cf   :  { %v1027_v19 = vpop.permute.xlu0 %1026  ;;  %v979_v20 = vpop.permute.xlu1 %978  ;;  %v1036_v32 = vadd.f32 %v1034_v13, %v2152_v48  ;;  %v884_v13 = vsel %vm818_vm2, %v2182_v30, %v2178_v28 }
 0x1d0   :  { %v1031_v23 = vsel %vm857_vm3, %v1027_v19, %v1029_v3  ;;  %v983_v24 = vsel %vm857_vm3, %v979_v20, %v981_v35  ;;  %v1066_v26 = vmax.f32 %v1062_v15, 0.0  ;;  %v1065_v59 = vmax.f32 %v1061_v14, 0.0 }
 0x1d1   :  { %v1035_v33 = vmax.f32 %v957_v10, %v1031_v23  ;;  %v990_v34 = vmax.f32 %v956_v16, %v983_v24  ;;  %v996_v35 = vmax.f32 %v992_v56, 0.0  ;;  %v1038_v41 = vmax.f32 %v1036_v32, 0.0 }
 0x1d2   :  { %v1068_v36 = vpack.c.bf16 %v1066_v26, %v1064_v21  ;;  %v1067_v37 = vpack.c.bf16 %v1065_v59, %v1063_v22  ;;  %v997_v3 = vmax.f32 %v993_v40, 0.0  ;;  %v893_v14 = vmax.f32 %v2062_v57, %v2176_v27 }
 0x1d3   :  { %v1037_v38 = vadd.f32 %v1035_v33, %v2158_v17  ;;  %v994_v39 = vadd.f32 %v990_v34, %v2158_v17  ;;  %v890_v16 = vmax.f32 %v2042_v47, %v884_v13  ;;  %v828_v19 = vmax.f32 %v2050_v51, %v2180_v29 }
 0x1d4   :  { %1174 = vrot.lane.b32.xlu0 %v1068_v36, %s1816_s19  ;;  %1172 = vrot.lane.b32.xlu1 %v1067_v37, %s1816_s19  ;;  %v1001_v5 = vpack.c.bf16 %v999_v44, %v997_v3  ;;  %v892_v57 = vmax.f32 %v2050_v51, %v885_v7  ;;  %v819_v21 = vsel %vm818_vm2, %v2186_v60, %v2182_v30  ;;  %s1827_s19 = smov 124  }
 0x1d5   :  { %v1039_v42 = vmax.f32 %v1037_v38, 0.0  ;;  %v998_v43 = vmax.f32 %v994_v39, 0.0  ;;  %v826_v27 = vmax.f32 %v2042_v47, %v2182_v30  ;;  %v820_v26 = vsel %vm818_vm2, %v2184_v58, %v2180_v29 }
 0x1d6   :  { %v825_v37 = vmax.f32 %v2038_v45, %v819_v21  ;;  %v827_v30 = vmax.f32 %v2046_v49, %v820_v26 }
 0x1d7   :  { %v1040_v62 = vpack.c.bf16 %v1039_v42, %v1038_v41  ;;  %v1000_v0 = vpack.c.bf16 %v998_v43, %v996_v35 }
 0x1d9   :  { %1167 = vrot.lane.b32.xlu1 %v1040_v62, %s1817_s20  ;;  %1159 = vrot.lane.b32.xlu0 %v1000_v0, %s1818_s21  ;;  %s1828_s20 = smov 122  }
 0x1dd   :  { %1161 = vrot.lane.b32.xlu1 %v1001_v5, %s1818_s21  ;;  %s1829_s21 = smov 118  }
 0x1e1   :  { %789 = vrot.lane.b32.xlu1 %v785_v6, %s1815_s2 }
 0x1e9   :  { %v852_v55 = vpop.permute.xlu1 %851 }
 0x1ea   :  { %v865_v33 = vmax.f32 %v826_v27, %v852_v55 }
 0x1ec   :  { %v869_v35 = vadd.f32 %v865_v33, %v2152_v48 }
 0x1ed   :  { %v856_v9 = vpop.permute.xlu0 %855  ;;  %v917_v10 = vpop.permute.xlu1 %916 }
 0x1ee   :  { %v929_v11 = vmax.f32 %v891_v8, %v917_v10  ;;  %v867_v22 = vmax.f32 %v828_v19, %v856_v9  ;;  %v873_v8 = vmax.f32 %v869_v35, 0.0 }
 0x1f0   :  { %v933_v53 = vadd.f32 %v929_v11, %v2152_v48  ;;  %v871_v31 = vadd.f32 %v867_v22, %v2158_v17 }
 0x1f1   :  { %v921_v15 = vpop.permute.xlu0 %920  ;;  %v915_v46 = vpop.permute.xlu1 %914 }
 0x1f2   :  { %v931_v52 = vmax.f32 %v893_v14, %v921_v15  ;;  %v922_v18 = vsel %vm857_vm3, %v915_v46, %v917_v10  ;;  %v937_v59 = vmax.f32 %v933_v53, 0.0  ;;  %v875_v62 = vmax.f32 %v871_v31, 0.0 }
 0x1f3   :  { %v928_v28 = vmax.f32 %v890_v16, %v922_v18  ;;  %v786_v10 = vmax.f32 %v2048_v50, %v2142_v12 }
 0x1f4   :  { %v935_v20 = vadd.f32 %v931_v52, %v2158_v17  ;;  %v877_v16 = vpack.c.bf16 %v875_v62, %v873_v8 }
 0x1f5   :  { %v919_v23 = vpop.permute.xlu0 %918  ;;  %v850_v24 = vpop.permute.xlu1 %849  ;;  %v932_v51 = vadd.f32 %v928_v28, %v2152_v48 }
 0x1f6   :  { %v939_v56 = vmax.f32 %v935_v20, 0.0  ;;  %v923_v32 = vsel %vm857_vm3, %v919_v23, %v921_v15  ;;  %v858_v36 = vsel %vm857_vm3, %v850_v24, %v852_v55 }
 0x1f7   :  { %v930_v34 = vmax.f32 %v892_v57, %v923_v32  ;;  %v864_v39 = vmax.f32 %v825_v37, %v858_v36  ;;  %v936_v41 = vmax.f32 %v932_v51, 0.0 }
 0x1f8   :  { %v941_v47 = vpack.c.bf16 %v939_v56, %v937_v59 }
 0x1f9   :  { %v934_v38 = vadd.f32 %v930_v34, %v2158_v17  ;;  %v854_v29 = vpop.permute.xlu0 %853  ;;  %v1072_v44 = vpop.permute.xlu1 %1071  ;;  %v868_v6 = vadd.f32 %v864_v39, %v2152_v48 }
 0x1fa   :  { %v859_v40 = vsel %vm857_vm3, %v854_v29, %v856_v9  ;;  %1154 = vrot.lane.b32.xlu0 %v941_v47, %s1819_s22  ;;  %v1075_v55 = vsel %vm818_vm2, %v2174_v54, %v1072_v44  ;;  %v1082_v13 = vmax.f32 %v2073_v63, %v1072_v44  ;;  %s1830_s22 = smov 116  }
 0x1fb   :  { %v938_v42 = vmax.f32 %v934_v38, 0.0  ;;  %v866_v43 = vmax.f32 %v827_v30, %v859_v40  ;;  %v1081_v14 = vmax.f32 %v2070_v61, %v1075_v55  ;;  %v872_v46 = vmax.f32 %v868_v6, 0.0  ;;  %v1806_v61 = vld [vmem:[%s2469_s3 + $0x4] ss:$8 sps:$4 sm:$0xff]   ;;  %v1808_v6 = vld [vmem:[%s2469_s3] ss:$8 sps:$4 sm:$0xff]  }
 0x1fc   :  { %1704 = vmatprep.mubr.msk.bf16.mxu1 %vm1199_vm4, %v1806_v61  ;;  %v775_v38 = vmax.f32 %v2038_v45, %v2186_v60  ;;  %v776_v40 = vmax.f32 %v2046_v49, %v2184_v58  ;;  %v1335_v61 = vld [vmem:[%s2471_s5 + $0x28] sm:$0xff] }
 0x1fd   :  { %v870_v0 = vadd.f32 %v866_v43, %v2158_v17  ;;  %v1074_v3 = vpop.permute.xlu0 %1073  ;;  %v940_v5 = vpack.c.bf16 %v938_v42, %v936_v41 }
 0x1fe   :  { %1149 = vrot.lane.b32.xlu0 %v941_v47, %s1820_s23  ;;  %v1076_v7 = vsel %vm818_vm2, %v2172_v25, %v1074_v3  ;;  %v1084_v50 = vmax.f32 %v2079_v4, %v1074_v3 }
 0x1ff   :  { %1147 = vrot.lane.b32.xlu1 %v940_v5, %s1820_s23  ;;  %v1106_v9 = vpop.permute.xlu1 %1105  ;;  %v874_v11 = vmax.f32 %v870_v0, 0.0  ;;  %v1083_v12 = vmax.f32 %v2076_v2, %v1076_v7  ;;  %v1824_v7 = vmov 1   ;;  %s1831_s23 = smov 114  }
 0x201   :  { %v1108_v15 = vpop.permute.xlu0 %1107  ;;  %v876_v63 = vpack.c.bf16 %v874_v11, %v872_v46  ;;  %v1333_v46 = vld [vmem:[%s2471_s5 + $0x18] sm:$0xff] }
 0x202   :  { %v1113_v54 = vsel %vm857_vm3, %v1106_v9, %v1108_v15  ;;  %v1120_v53 = vmax.f32 %v1082_v13, %v1108_v15  ;;  %791 = vrot.lane.b32.xlu0 %v786_v10, %s1815_s2  ;;  %v1264_v9 = vld [vmem:[%s2470_s4] sm:$0xff]  ;;  %v1332_v15 = vld [vmem:[%s2471_s5 + $0x10] sm:$0xff] }
 0x203   :  { %v1119_v52 = vmax.f32 %v1081_v14, %v1113_v54  ;;  %1142 = vrot.lane.b32.xlu1 %v877_v16, %s1815_s2  ;;  %v1110_v18 = vpop.permute.xlu1 %1109  ;;  %v1330_v13 = vld [vmem:[%s2471_s5] sm:$0xff]  ;;  %v1265_v14 = vld [vmem:[%s2470_s4 + $0x8] sm:$0xff]  ;;  %s1825_s4 = smov 92  }
 0x204   :  { %v1124_v19 = vadd.f32 %v1120_v53, %v2152_v48 }
 0x205   :  { %v1112_v25 = vpop.permute.xlu0 %1111  ;;  %v1123_v57 = vadd.f32 %v1119_v52, %v2152_v48 }
 0x206   :  { %v1114_v28 = vsel %vm857_vm3, %v1110_v18, %v1112_v25  ;;  %v1122_v20 = vmax.f32 %v1084_v50, %v1112_v25  ;;  %1135 = vrot.lane.b32.xlu0 %v876_v63, %s1821_s26  ;;  %v1128_v22 = vmax.f32 %v1124_v19, 0.0  ;;  %v1334_v63 = vld [vmem:[%s2471_s5 + $0x20] sm:$0xff]  ;;  %v1337_v18 = vld [vmem:[%s2471_s5 + $0x38] sm:$0xff]  ;;  %v1339_v19 = vld [vmem:[%s2471_s5 + $0x48] sm:$0xff] }
 0x207   :  { %v1121_v4 = vmax.f32 %v1083_v12, %v1114_v28  ;;  %1137 = vrot.lane.b32.xlu1 %v877_v16, %s1821_s26  ;;  %v1127_v23 = vmax.f32 %v1123_v57, 0.0  ;;  %v1331_v16 = vld [vmem:[%s2471_s5 + $0x8] sm:$0xff]  ;;  %v1336_v12 = vld [vmem:[%s2471_s5 + $0x30] sm:$0xff]  ;;  %v1338_v25 = vld [vmem:[%s2471_s5 + $0x40] sm:$0xff] }
 0x208   :  { %v1126_v21 = vadd.f32 %v1122_v20, %v2158_v17  ;;  %v1340_v28 = vld [vmem:[%s2471_s5 + $0x50] sm:$0xff]  ;;  %v1341_v20 = vld [vmem:[%s2471_s5 + $0x58] sm:$0xff]  ;;  %v1342_v57 = vld [vmem:[%s2471_s5 + $0x60] sm:$0xff] }
 0x209   :  { %v1125_v27 = vadd.f32 %v1121_v4, %v2158_v17  ;;  %v1343_v4 = vld [vmem:[%s2471_s5 + $0x68] sm:$0xff] }
 0x20a   :  { %v1130_v2 = vmax.f32 %v1126_v21, 0.0  ;;  %v1344_v21 = vld [vmem:[%s2471_s5 + $0x70] sm:$0xff] }
 0x20b   :  { %v1129_v24 = vmax.f32 %v1125_v27, 0.0  ;;  %v1345_v27 = vld [vmem:[%s2471_s5 + $0x78] sm:$0xff] }
 0x20c   :  { %v1132_v26 = vpack.c.bf16 %v1130_v2, %v1128_v22  ;;  %v1346_v22 = vld [vmem:[%s2471_s5 + $0x80] sm:$0xff] }
 0x20d   :  { %v1131_v59 = vpack.c.bf16 %v1129_v24, %v1127_v23 }
 0x20e   :  { %1183 = vrot.lane.b32.xlu1 %v1132_v26, %s1822_s1 }
 0x20f   :  { %1181 = vrot.lane.b32.xlu0 %v1131_v59, %s1822_s1 }
 0x246   :  { %v1175_v56 = vpop.permute.xlu0 %1174  ;;  %v1173_v32 = vpop.permute.xlu1 %1172 }
 0x247   :  { %v1177_v33 = vsel %vm1176_vm5, %v1173_v32, %v1175_v56 }
 0x248   :  { %1204 = vmatpush1.bf16.msra.mxu1 %v1177_v33 }
 0x249   :  { %1205 = vmatprep.subr.bf16.mxu1 %v1811_v1 }
 0x24b   :  { %v1168_v51 = vpop.permute.xlu1 %1167  ;;  %v1160_v34 = vpop.permute.xlu0 %1159 }
 0x24c   :  { %1206 = vmatpush1.bf16.msra.mxu1 %v1168_v51 }
 0x24d   :  { %1207 = vmatprep.subr.bf16.mxu1 %v1811_v1 }
 0x24f   :  { %v1162_v36 = vpop.permute.xlu1 %1161 }
 0x250   :  { %v1164_v37 = vsel %vm1163_vm6, %v1160_v34, %v1162_v36 }
 0x251   :  { %1208 = vmatpush1.bf16.msra.mxu1 %v1164_v37 }
 0x252   :  { %1209 = vmatprep.subr.bf16.mxu1 %v1811_v1 }
 0x253   :  { %v790_v30 = vpop.permute.xlu1 %789 }
 0x254   :  { %v795_v35 = vmax.f32 %v775_v38, %v790_v30 }
 0x256   :  { %v807_v44 = vadd.f32 %v2152_v48, %v795_v35 }
 0x258   :  { %v809_v49 = vmax.f32 %v807_v44, 0.0 }
 0x26c   :  { %v1155_v47 = vpop.permute.xlu0 %1154 }
 0x26d   :  { %1210 = vmatpush1.bf16.msra.mxu1 %v1155_v47 }
 0x26e   :  { %1211 = vmatprep.subr.bf16.mxu1 %v1811_v1 }
 0x270   :  { %v1150_v31 = vpop.permute.xlu0 %1149 }
 0x271   :  { %v1148_v29 = vpop.permute.xlu1 %1147 }
 0x272   :  { %v1152_v39 = vsel %vm1151_vm7, %v1148_v29, %v1150_v31 }
 0x273   :  { %1212 = vmatpush1.bf16.msra.mxu1 %v1152_v39 }
 0x274   :  { %v792_v41 = vpop.permute.xlu0 %791  ;;  %1213 = vmatprep.subr.bf16.mxu1 %v1811_v1 }
 0x275   :  { %v796_v42 = vmax.f32 %v776_v40, %v792_v41  ;;  %v1143_v43 = vpop.permute.xlu1 %1142 }
 0x277   :  { %v808_v62 = vadd.f32 %v2158_v17, %v796_v42  ;;  %1214 = vmatpush1.bf16.msra.mxu1 %v1143_v43 }
 0x278   :  { %v1136_v0 = vpop.permute.xlu0 %1135  ;;  %1215 = vmatprep.subr.bf16.mxu1 %v1811_v1 }
 0x279   :  { %v810_v45 = vmax.f32 %v808_v62, 0.0  ;;  %v1138_v60 = vpop.permute.xlu1 %1137 }
 0x27a   :  { %v1140_v3 = vsel %vm1139_vm8, %v1136_v0, %v1138_v60  ;;  %v1347_v60 = vld [vmem:[%s2471_s5 + $0x88] sm:$0xff] }
 0x27b   :  { %1216 = vmatpush1.bf16.msra.mxu1 %v1140_v3  ;;  %v811_v58 = vpack.c.bf16 %v810_v45, %v809_v49  ;;  %v1631_v49 = vld [vmem:[%s2472_s6] sm:$0x3] }
 0x27c   :  { %1217 = vmatprep.subr.bf16.mxu1 %v1811_v1 }
 0x27f   :  { %1218 = vmatpush1.bf16.msra.mxu1 %v811_v58 }
 0x280   :  { %v1184_v5 = vpop.permute.xlu1 %1183  ;;  %1233 = vmatprep.subr.bf16.mxu1 %v1811_v1 }
 0x281   :  { %v1182_v48 = vpop.permute.xlu0 %1181 }
 0x282   :  { %v1186_v17 = vsel %vm1185_vm9, %v1182_v48, %v1184_v5 }
 0x283   :  { %1234 = vmatpush2.bf16.msra.mxu1 %v1186_v17 }
 0x286   :  { %1236 = vmatmul.mubr.bf16.vlgmr.msra.gmra.mxu1 %v1808_v6 }
 0x346   :  { %v1237_v55 = vpop.f32.mrf.mxu1 }
 0x347   :  { %1246 = vrot.lane.b32.xlu0 %v1237_v55, %s1823_s29 }
 0x348   :  { %v1239_v8 = vpop.f32.mrf.mxu1 }
 0x34a   :  { %v1240_v10 = vpop.f32.mrf.mxu1 }
 0x34b   :  { %1268 = vperm.xlu0 %1737, %v1264_v9   ;;  %1248 = vrot.lane.b32.xlu1 %v1240_v10, %s1823_s29 }
 0x34c   :  { %v1242_v11 = vpop.f32.mrf.mxu1 }
 0x34f   :  { %1350 = vperm.xlu0 %1737, %v1330_v13   ;;  %1273 = vperm.xlu1 %1738, %v1265_v14  }
 0x353   :  { %1360 = vperm.xlu0 %1737, %v1332_v15   ;;  %1355 = vperm.xlu1 %1738, %v1331_v16  }
 0x357   :  { %1365 = vperm.xlu1 %1738, %v1333_v46   ;;  %1739 = vset.pattern.permute.xlu0 %v1824_v7 }
 0x358   :  { %1499 = vperm.xlu0 %1739, %v1330_v13  }
 0x35b   :  { %1740 = vset.pattern.permute.xlu1 %v1824_v7 }
 0x35c   :  { %1503 = vperm.xlu1 %1740, %v1331_v16  }
 0x360   :  { %1507 = vperm.xlu1 %1740, %v1332_v15  }
 0x364   :  { %1741 = vset.pattern.permute.xlu1 %v1811_v1 }
 0x3b9   :  { %v1247_v54 = vpop.permute.xlu0 %1246 }
 0x3ba   :  { %v1252_v53 = vmax.f32 %v1237_v55, %v1247_v54 }
 0x3bc   :  { %1256 = vrot.lane.b32.xlu0 %v1252_v53, %s1825_s4 }
 0x3bd   :  { %v1249_v52 = vpop.permute.xlu1 %1248 }
 0x3be   :  { %v1253_v50 = vmax.f32 %v1240_v10, %v1249_v52 }
 0x3c0   :  { %1511 = vperm.xlu0 %1739, %v1333_v46   ;;  %1258 = vrot.lane.b32.xlu1 %v1253_v50, %s1825_s4 }
 0x3c4   :  { %1515 = vperm.xlu0 %1739, %v1334_v63   ;;  %1370 = vperm.xlu1 %1741, %v1334_v63  }
 0x3c6   :  { %v1269_v2 = vpop.permute.xlu0 %1268 }
 0x3c8   :  { %1519 = vperm.xlu0 %1739, %v1335_v61   ;;  %1375 = vperm.xlu1 %1741, %v1335_v61  }
 0x3ca   :  { %v1274_v23 = vpop.permute.xlu1 %1273  ;;  %v1351_v24 = vpop.permute.xlu0 %1350 }
 0x3cc   :  { %1523 = vperm.xlu0 %1739, %v1336_v12   ;;  %1380 = vperm.xlu1 %1741, %v1336_v12  }
 0x3ce   :  { %v1356_v26 = vpop.permute.xlu1 %1355  ;;  %v2353_v59 = vpop.permute.xlu0 %1360 }
 0x3d0   :  { %1527 = vperm.xlu0 %1739, %v1337_v18   ;;  %1385 = vperm.xlu1 %1741, %v1337_v18  }
 0x3d2   :  { %v2355_v56 = vpop.permute.xlu1 %1365 }
 0x3d3   :  { %v1500_v33 = vpop.permute.xlu0 %1499 }
 0x3d4   :  { %1531 = vperm.xlu0 %1739, %v1338_v25   ;;  %1390 = vperm.xlu1 %1741, %v1338_v25  }
 0x3d7   :  { %v1504_v32 = vpop.permute.xlu1 %1503 }
 0x3d8   :  { %1535 = vperm.xlu0 %1739, %v1339_v19   ;;  %1395 = vperm.xlu1 %1741, %v1339_v19  }
 0x3db   :  { %v2357_v51 = vpop.permute.xlu1 %1507 }
 0x3dc   :  { %1539 = vperm.xlu0 %1739, %v1340_v28   ;;  %1400 = vperm.xlu1 %1741, %v1340_v28  }
 0x3e0   :  { %1543 = vperm.xlu0 %1739, %v1341_v20   ;;  %1405 = vperm.xlu1 %1741, %v1341_v20  }
 0x3e4   :  { %1547 = vperm.xlu0 %1739, %v1342_v57   ;;  %1410 = vperm.xlu1 %1741, %v1342_v57  }
 0x3e8   :  { %1551 = vperm.xlu0 %1739, %v1343_v4   ;;  %1415 = vperm.xlu1 %1741, %v1343_v4  }
 0x3ec   :  { %1555 = vperm.xlu0 %1739, %v1344_v21   ;;  %1420 = vperm.xlu1 %1741, %v1344_v21  }
 0x3f0   :  { %1559 = vperm.xlu0 %1739, %v1345_v27   ;;  %1425 = vperm.xlu1 %1741, %v1345_v27  }
 0x3f4   :  { %1563 = vperm.xlu0 %1739, %v1346_v22   ;;  %1430 = vperm.xlu1 %1741, %v1346_v22  }
 0x42e   :  { %v1257_v34 = vpop.permute.xlu0 %1256 }
 0x42f   :  { %v1262_v36 = vmax.f32 %v1252_v53, %v1257_v34 }
 0x431   :  { %v1276_v37 = vadd.f32 %v1269_v2, %v1262_v36 }
 0x432   :  { %v1259_v47 = vpop.permute.xlu1 %1258 }
 0x433   :  { %v1278_v30 = vmax.f32 %v1276_v37, 0.0  ;;  %v1263_v31 = vmax.f32 %v1253_v50, %v1259_v47 }
 0x435   :  { %v1277_v38 = vadd.f32 %v1274_v23, %v1263_v31  ;;  %1282 = vrot.lane.b32.xlu0 %v1278_v30, %s1826_s18  ;;  %v1570_v29 = vmul.f32 %v1500_v33, %v1278_v30  ;;  %v1438_v40 = vmul.f32 %v1351_v24, %v1278_v30 }
 0x437   :  { %v1279_v39 = vmax.f32 %v1277_v38, 0.0  ;;  %v1457_v42 = vsel %vm1456_vm10, %v1438_v40, 0.0  ;;  %v1588_v43 = vsel %vm1456_vm10, %v1570_v29, 0.0 }
 0x439   :  { %1288 = vrot.lane.b32.xlu0 %v1278_v30, %s1827_s19  ;;  %1284 = vrot.lane.b32.xlu1 %v1279_v39, %s1826_s18  ;;  %v1439_v35 = vmul.f32 %v1356_v26, %v1279_v39  ;;  %v1571_v41 = vmul.f32 %v1504_v32, %v1279_v39 }
 0x43b   :  { %v1458_v44 = vsel %vm1456_vm10, %v1439_v35, 0.0  ;;  %v1589_v62 = vsel %vm1456_vm10, %v1571_v41, 0.0  ;;  %v1512_v3 = vpop.permute.xlu0 %1511 }
 0x43c   :  { %v2363_v0 = vadd.f32 %v1458_v44, %v1457_v42  ;;  %v2365_v45 = vadd.f32 %v1589_v62, %v1588_v43 }
 0x43d   :  { %1294 = vrot.lane.b32.xlu0 %v1278_v30, %s1828_s20  ;;  %1290 = vrot.lane.b32.xlu1 %v1279_v39, %s1827_s19 }
 0x43f   :  { %v1516_v58 = vpop.permute.xlu0 %1515  ;;  %v1371_v5 = vpop.permute.xlu1 %1370 }
 0x441   :  { %1300 = vrot.lane.b32.xlu0 %v1278_v30, %s1814_s0  ;;  %1296 = vrot.lane.b32.xlu1 %v1279_v39, %s1828_s20 }
 0x443   :  { %v1520_v48 = vpop.permute.xlu0 %1519  ;;  %v1376_v17 = vpop.permute.xlu1 %1375 }
 0x445   :  { %1306 = vrot.lane.b32.xlu0 %v1278_v30, %s1829_s21  ;;  %1302 = vrot.lane.b32.xlu1 %v1279_v39, %s1814_s0 }
 0x447   :  { %v1524_v6 = vpop.permute.xlu0 %1523  ;;  %v1381_v55 = vpop.permute.xlu1 %1380 }
 0x449   :  { %1312 = vrot.lane.b32.xlu0 %v1278_v30, %s1830_s22  ;;  %1308 = vrot.lane.b32.xlu1 %v1279_v39, %s1829_s21 }
 0x44b   :  { %v1528_v8 = vpop.permute.xlu0 %1527  ;;  %v1386_v9 = vpop.permute.xlu1 %1385 }
 0x44d   :  { %1318 = vrot.lane.b32.xlu0 %v1278_v30, %s1831_s23  ;;  %1314 = vrot.lane.b32.xlu1 %v1279_v39, %s1830_s22 }
 0x44f   :  { %v1532_v10 = vpop.permute.xlu0 %1531  ;;  %v1391_v11 = vpop.permute.xlu1 %1390 }
 0x451   :  { %1324 = vrot.lane.b32.xlu0 %v1278_v30, %s1815_s2  ;;  %1320 = vrot.lane.b32.xlu1 %v1279_v39, %s1831_s23 }
 0x453   :  { %v2378_v13 = vpop.permute.xlu0 %1535  ;;  %v2380_v14 = vpop.permute.xlu1 %1395 }
 0x455   :  { %1567 = vperm.xlu0 %1739, %v1347_v60   ;;  %1326 = vrot.lane.b32.xlu1 %v1279_v39, %s1815_s2 }
 0x457   :  { %v2384_v15 = vpop.permute.xlu1 %1400 }
 0x459   :  { %1435 = vperm.xlu1 %1741, %v1347_v60   ;;  %1742 = vset.pattern.permute.xlu0 %v1811_v1  ;;  %v2382_v1 = vpop.permute.xlu0 %1539 }
 0x45b   :  { %v2388_v46 = vpop.permute.xlu1 %1405 }
 0x45d   :  { %1634 = vperm.xlu1 %1741, %v1631_v49   ;;  %v2386_v16 = vpop.permute.xlu0 %1543 }
 0x45f   :  { %v2392_v54 = vpop.permute.xlu1 %1410 }
 0x461   :  { %v2390_v7 = vpop.permute.xlu0 %1547 }
 0x463   :  { %v2396_v52 = vpop.permute.xlu1 %1415 }
 0x465   :  { %v2394_v53 = vpop.permute.xlu0 %1551 }
 0x467   :  { %v2400_v63 = vpop.permute.xlu1 %1420 }
 0x469   :  { %v2398_v50 = vpop.permute.xlu0 %1555 }
 0x46b   :  { %v2404_v12 = vpop.permute.xlu1 %1425 }
 0x46d   :  { %v2402_v61 = vpop.permute.xlu0 %1559 }
 0x46f   :  { %v2408_v25 = vpop.permute.xlu1 %1430 }
 0x471   :  { %v2406_v18 = vpop.permute.xlu0 %1563 }
 0x4a7   :  { %v1283_v19 = vpop.permute.xlu0 %1282 }
 0x4a8   :  { %v1440_v28 = vmul.f32 %v2353_v59, %v1283_v19  ;;  %v1572_v20 = vmul.f32 %v2357_v51, %v1283_v19 }
 0x4aa   :  { %v1460_v57 = vsel %vm1456_vm10, %v1440_v28, 0.0  ;;  %v1591_v4 = vsel %vm1456_vm10, %v1572_v20, 0.0 }
 0x4ab   :  { %v1289_v21 = vpop.permute.xlu0 %1288  ;;  %v1285_v27 = vpop.permute.xlu1 %1284  ;;  %v1461_v26 = vadd.f32 %v1460_v57, %v2363_v0  ;;  %v1592_v32 = vadd.f32 %v1591_v4, %v2365_v45 }
 0x4ac   :  { %v1442_v22 = vmul.f32 %v1371_v5, %v1289_v21  ;;  %v1574_v2 = vmul.f32 %v1516_v58, %v1289_v21  ;;  %v1441_v23 = vmul.f32 %v2355_v56, %v1285_v27  ;;  %v1573_v24 = vmul.f32 %v1512_v3, %v1285_v27 }
 0x4ae   :  { %v1462_v33 = vsel %vm1456_vm10, %v1441_v23, 0.0  ;;  %v1593_v59 = vsel %vm1456_vm10, %v1573_v24, 0.0  ;;  %v1464_v51 = vsel %vm1456_vm10, %v1442_v22, 0.0  ;;  %v1595_v34 = vsel %vm1456_vm10, %v1574_v2, 0.0 }
 0x4af   :  { %v1463_v36 = vadd.f32 %v1462_v33, %v1461_v26  ;;  %v1594_v37 = vadd.f32 %v1593_v59, %v1592_v32  ;;  %v1295_v47 = vpop.permute.xlu0 %1294  ;;  %v1291_v30 = vpop.permute.xlu1 %1290 }
 0x4b0   :  { %v1444_v31 = vmul.f32 %v1381_v55, %v1295_v47  ;;  %v1576_v38 = vmul.f32 %v1524_v6, %v1295_v47  ;;  %v1443_v56 = vmul.f32 %v1376_v17, %v1291_v30  ;;  %v1575_v29 = vmul.f32 %v1520_v48, %v1291_v30 }
 0x4b1   :  { %v1465_v39 = vadd.f32 %v1464_v51, %v1463_v36  ;;  %v1596_v40 = vadd.f32 %v1595_v34, %v1594_v37 }
 0x4b2   :  { %v1466_v35 = vsel %vm1456_vm10, %v1443_v56, 0.0  ;;  %v1597_v41 = vsel %vm1456_vm10, %v1575_v29, 0.0  ;;  %v1468_v42 = vsel %vm1456_vm10, %v1444_v31, 0.0  ;;  %v1599_v43 = vsel %vm1456_vm10, %v1576_v38, 0.0 }
 0x4b3   :  { %v1467_v44 = vadd.f32 %v1466_v35, %v1465_v39  ;;  %v1598_v62 = vadd.f32 %v1597_v41, %v1596_v40  ;;  %v1301_v0 = vpop.permute.xlu0 %1300  ;;  %v1297_v45 = vpop.permute.xlu1 %1296 }
 0x4b4   :  { %v1446_v60 = vmul.f32 %v1391_v11, %v1301_v0  ;;  %v1578_v3 = vmul.f32 %v1532_v10, %v1301_v0  ;;  %v1445_v49 = vmul.f32 %v1386_v9, %v1297_v45  ;;  %v1577_v58 = vmul.f32 %v1528_v8, %v1297_v45 }
 0x4b5   :  { %v1469_v5 = vadd.f32 %v1468_v42, %v1467_v44  ;;  %v1600_v48 = vadd.f32 %v1599_v43, %v1598_v62 }
 0x4b6   :  { %v1470_v17 = vsel %vm1456_vm10, %v1445_v49, 0.0  ;;  %v1601_v6 = vsel %vm1456_vm10, %v1577_v58, 0.0  ;;  %v1472_v55 = vsel %vm1456_vm10, %v1446_v60, 0.0  ;;  %v1603_v4 = vsel %vm1456_vm10, %v1578_v3, 0.0 }
 0x4b7   :  { %v1471_v19 = vadd.f32 %v1470_v17, %v1469_v5  ;;  %v1602_v28 = vadd.f32 %v1601_v6, %v1600_v48  ;;  %v1307_v20 = vpop.permute.xlu0 %1306  ;;  %v1303_v57 = vpop.permute.xlu1 %1302 }
 0x4b8   :  { %v1580_v21 = vmul.f32 %v2382_v1, %v1307_v20  ;;  %v1447_v10 = vmul.f32 %v2380_v14, %v1303_v57  ;;  %v1579_v8 = vmul.f32 %v2378_v13, %v1303_v57  ;;  %v1448_v9 = vmul.f32 %v2384_v15, %v1307_v20 }
 0x4b9   :  { %v1473_v11 = vadd.f32 %v1472_v55, %v1471_v19  ;;  %v1604_v27 = vadd.f32 %v1603_v4, %v1602_v28 }
 0x4ba   :  { %v1474_v22 = vsel %vm1456_vm10, %v1447_v10, 0.0  ;;  %v1605_v2 = vsel %vm1456_vm10, %v1579_v8, 0.0  ;;  %v1607_v33 = vsel %vm1456_vm10, %v1580_v21, 0.0  ;;  %v1476_v13 = vsel %vm1456_vm10, %v1448_v9, 0.0 }
 0x4bb   :  { %v1475_v23 = vadd.f32 %v1474_v22, %v1473_v11  ;;  %v1606_v24 = vadd.f32 %v1605_v2, %v1604_v27  ;;  %v1313_v26 = vpop.permute.xlu0 %1312  ;;  %v1309_v32 = vpop.permute.xlu1 %1308 }
 0x4bc   :  { %v1449_v1 = vmul.f32 %v2388_v46, %v1309_v32  ;;  %v1581_v14 = vmul.f32 %v2386_v16, %v1309_v32  ;;  %v1582_v15 = vmul.f32 %v2390_v7, %v1313_v26  ;;  %v1450_v31 = vmul.f32 %v2392_v54, %v1313_v26 }
 0x4bd   :  { %v1608_v59 = vadd.f32 %v1607_v33, %v1606_v24  ;;  %v1477_v51 = vadd.f32 %v1476_v13, %v1475_v23 }
 0x4be   :  { %v1609_v34 = vsel %vm1456_vm10, %v1581_v14, 0.0  ;;  %v1478_v36 = vsel %vm1456_vm10, %v1449_v1, 0.0  ;;  %v1611_v46 = vsel %vm1456_vm10, %v1582_v15, 0.0  ;;  %v1480_v40 = vsel %vm1456_vm10, %v1450_v31, 0.0 }
 0x4bf   :  { %v1610_v37 = vadd.f32 %v1609_v34, %v1608_v59  ;;  %v1315_v47 = vpop.permute.xlu1 %1314  ;;  %v1479_v38 = vadd.f32 %v1478_v36, %v1477_v51  ;;  %v1319_v16 = vpop.permute.xlu0 %1318 }
 0x4c0   :  { %v1583_v30 = vmul.f32 %v2394_v53, %v1315_v47  ;;  %v1451_v29 = vmul.f32 %v2396_v52, %v1315_v47  ;;  %v1584_v35 = vmul.f32 %v2398_v50, %v1319_v16  ;;  %v1452_v43 = vmul.f32 %v2400_v63, %v1319_v16 }
 0x4c1   :  { %v1612_v56 = vadd.f32 %v1611_v46, %v1610_v37  ;;  %v1481_v41 = vadd.f32 %v1480_v40, %v1479_v38 }
 0x4c2   :  { %v1613_v7 = vsel %vm1456_vm10, %v1583_v30, 0.0  ;;  %v1482_v53 = vsel %vm1456_vm10, %v1451_v29, 0.0  ;;  %v1615_v44 = vsel %vm1456_vm10, %v1584_v35, 0.0  ;;  %v1484_v3 = vsel %vm1456_vm10, %v1452_v43, 0.0 }
 0x4c3   :  { %v1321_v39 = vpop.permute.xlu1 %1320  ;;  %v1614_v42 = vadd.f32 %v1613_v7, %v1612_v56  ;;  %v1483_v62 = vadd.f32 %v1482_v53, %v1481_v41  ;;  %v1325_v0 = vpop.permute.xlu0 %1324 }
 0x4c4   :  { %v1585_v54 = vmul.f32 %v2402_v61, %v1321_v39  ;;  %v1453_v45 = vmul.f32 %v2404_v12, %v1321_v39  ;;  %v1586_v50 = vmul.f32 %v2406_v18, %v1325_v0  ;;  %v1454_v63 = vmul.f32 %v2408_v25, %v1325_v0 }
 0x4c5   :  { %v1616_v52 = vadd.f32 %v1615_v44, %v1614_v42  ;;  %v1485_v49 = vadd.f32 %v1484_v3, %v1483_v62 }
 0x4c6   :  { %v1617_v60 = vsel %vm1456_vm10, %v1585_v54, 0.0  ;;  %v1486_v5 = vsel %vm1456_vm10, %v1453_v45, 0.0  ;;  %v1619_v17 = vsel %vm1456_vm10, %v1586_v50, 0.0  ;;  %v1488_v57 = vsel %vm1456_vm10, %v1454_v63, 0.0 }
 0x4c7   :  { %v1618_v58 = vadd.f32 %v1617_v60, %v1616_v52  ;;  %v1327_v61 = vpop.permute.xlu1 %1326  ;;  %v1487_v55 = vadd.f32 %v1486_v5, %v1485_v49 }
 0x4c9   :  { %v1620_v19 = vadd.f32 %v1619_v17, %v1618_v58  ;;  %v1489_v21 = vadd.f32 %v1488_v57, %v1487_v55 }
 0x4d0   :  { %v1568_v48 = vpop.permute.xlu0 %1567 }
 0x4d1   :  { %v1587_v6 = vmul.f32 %v1568_v48, %v1327_v61 }
 0x4d3   :  { %v1621_v12 = vsel %vm1456_vm10, %v1587_v6, 0.0 }
 0x4d4   :  { %v1622_v28 = vadd.f32 %v1621_v12, %v1620_v19  ;;  %v1436_v20 = vpop.permute.xlu1 %1435 }
 0x4d5   :  { %v1455_v18 = vmul.f32 %v1436_v20, %v1327_v61 }
 0x4d6   :  { %v1623_v4 = vrot.slane %v1622_v28, 4 }
 0x4d7   :  { %v1490_v10 = vsel %vm1456_vm10, %v1455_v18, 0.0 }
 0x4d8   :  { %v1624_v8 = vadd.f32 %v1623_v4, %v1622_v28  ;;  %v1491_v9 = vadd.f32 %v1490_v10, %v1489_v21  ;;  %v1635_v14 = vpop.permute.xlu1 %1634 }
 0x4da   :  { %v1625_v11 = vrot.slane %v1624_v8, 2  ;;  %v1492_v25 = vrot.slane %v1491_v9, 4 }
 0x4dc   :  { %v1626_v27 = vadd.f32 %v1625_v11, %v1624_v8  ;;  %v1493_v22 = vadd.f32 %v1492_v25, %v1491_v9 }
 0x4de   :  { %v1494_v2 = vrot.slane %v1493_v22, 2  ;;  %v1627_v24 = vrot.slane %v1626_v27, 1 }
 0x4e0   :  { %v1495_v23 = vadd.f32 %v1494_v2, %v1493_v22  ;;  %v1628_v33 = vadd.f32 %v1627_v24, %v1626_v27 }
 0x4e2   :  { %v1496_v26 = vrot.slane %v1495_v23, 1 }
 0x4e4   :  { %v1497_v32 = vadd.f32 %v1496_v26, %v1495_v23 }
 0x4e6   :  { %v1630_v1 = vsel %vm1629_vm11, %v1497_v32, %v1628_v33 }
 0x4e7   :  { %v1637_v13 = vadd.f32 %v1635_v14, %v1630_v1 }
 0x4e9   :  { %v1638_v15 = vmul.f32 0.5, %v1637_v13 }
 0x4eb   :  { %1809 = vtanh.f32 %v1638_v15 }
 0x4f8   :  { %v1810_v59 = vpop.eup %1809 }
 0x4f9   :  { %v1640_v51 = vadd.f32 1.0, %v1810_v59 }
 0x4fb   :  { %v1641_v34 = vmul.f32 0.5, %v1640_v51 }
 0x4fd   :  { %1643 = vst.msk [vmem:[%s2473_s7] sm:$0x3] %vm1642_vm12, %v1641_v34 }

</bundles_post_ra>
